<compile_context>
chip_gen: v5e
topology: v5e:2x2
jax: 0.10.0
libtpu: 0.0.40
codegen_flags: <defaults>
</compile_context>

<pallas_src>
import jax
import jax.numpy as jnp
from jax.experimental import pallas as pl
from jax.experimental.pallas import tpu as pltpu


# ---------------------------------------------------------------------------
# Pallas kernel
# ---------------------------------------------------------------------------
def _make_resblock_kernel(Bt, Cp, HW, Cg, shifts):
    """Kernel body: Bt samples per grid step, channels-major (Cp, HW) layout."""
    Gp = Cp // Cg
    inv_count = 1.0 / float(HW * Cg)     # 1 / (#elements per GroupNorm group)
    eps = 1e-5

    def kernel(x_ref, w1_ref, g1_ref, b1_ref, w2_ref, g2_ref, b2_ref,
               masks_ref, o_ref):
        # Hoisted once per grid step (shared by all Bt samples and both convs).
        masks = masks_ref[...]                                  # (9, HW) bf16
        mask_rows = [masks[t:t + 1, :] for t in range(9)]       # (1, HW) each
        g1, b1 = g1_ref[...], b1_ref[...]                       # (Cp, 1) f32
        g2, b2 = g2_ref[...], b2_ref[...]

        def group_sum(s):
            # s: (Cp, 1) per-channel values -> per-channel value of its group's
            # sum.  Pure VPU/XLU reshape-reduce; no MXU involvement.
            if Cg == 1:
                return s
            sg = jnp.sum(s.reshape(Gp, Cg, 1), axis=1, keepdims=True)  # (Gp,1,1)
            return jnp.broadcast_to(sg, (Gp, Cg, 1)).reshape(Cp, 1)

        def group_norm_relu(v, gamma, beta):
            # v: (Cp, HW) f32.  Two-pass (centered) variance -> no
            # E[x^2]-E[x]^2 cancellation.  GN math stays f32 on the VPU/EUP.
            s = jnp.sum(v, axis=1, keepdims=True)                # (Cp, 1)
            mean = group_sum(s) * inv_count
            d = v - mean
            var = group_sum(jnp.sum(d * d, axis=1, keepdims=True)) * inv_count
            inv = jax.lax.rsqrt(var + eps)
            return jnp.maximum(d * (inv * gamma) + beta, 0.0)    # fused ReLU

        def conv3x3(v, w_taps_ref):
            # v: (Cp, HW) f32; w_taps_ref: (9, Cp, Cp) bf16, tap-major.
            # Per tap: XLU lane roll, bf16 cast, bf16 border mask (this *is*
            # the zero padding), then an accumulating MXU matmul.  No im2col
            # (9C, HW) buffer is ever materialized.
            acc = None
            for t, sh in enumerate(shifts):
                if sh == 0:                       # center tap: no shift, mask=1
                    vt = v.astype(jnp.bfloat16)
                else:
                    vt = pltpu.roll(v, sh, axis=1).astype(jnp.bfloat16)
                    vt = vt * mask_rows[t]
                part = jnp.dot(w_taps_ref[t], vt,
                               preferred_element_type=jnp.float32)
                acc = part if acc is None else acc + part
            return acc                                           # (Cp, HW) f32

        for b in range(Bt):            # static unroll; Bt is kept small
            x = x_ref[b]                                         # (Cp, HW) f32
            h = group_norm_relu(x, g1, b1)
            h = conv3x3(h, w1_ref)
            # TODO(synk): nn.Dropout is identity in eval mode; training-mode
            # dropout (random masking + 1/(1-p) scaling) is not implemented.
            h = group_norm_relu(h, g2, b2)
            h = conv3x3(h, w2_ref)
            # Residual shortcut: re-read x (keeps its live range short).
            o_ref[b] = h + x_ref[b]

    return kernel


# ---------------------------------------------------------------------------
# Wrapper
# ---------------------------------------------------------------------------
def resblock_forward(x_nchw, w1_hwio, g1, b1, w2_hwio, g2, b2):
    """ResBlock forward (eval mode).

    x_nchw: (B, C, H, W) f32;  w*: (3, 3, C, C) HWIO;  g*/b*: (C,) f32.
    """
    B, C, H, W = x_nchw.shape
    G = min(32, C)
    assert C % G == 0, "GroupNorm requires C % num_groups == 0"
    Cg = C // G
    HW = H * W

    # --- channel padding: sublane dim -> multiple of 8 ----------------------
    # Padded channels are appended as whole dummy groups (zero data, zero
    # gamma/beta, zero weight rows/cols), so they stay exactly 0 end-to-end and
    # never perturb the real groups' statistics.
    pad = 0
    for k in range(8):
        if (C + k * Cg) % 8 == 0:
            pad = k * Cg
            break
    Cp = C + pad

    # Channels-major layout: NCHW only needs a reshape at the boundary.
    x = x_nchw.reshape(B, C, HW).astype(jnp.float32)
    if pad:
        x = jnp.pad(x, ((0, 0), (0, pad), (0, 0)))

    # Conv weights: HWIO (ky, kx, ci, co) -> (9, co, ci) tap-major, bf16.
    def pack_w(w):
        wt = jnp.transpose(w, (0, 1, 3, 2)).reshape(9, C, C)
        if pad:
            wt = jnp.pad(wt, ((0, 0), (0, pad), (0, pad)))
        return wt.astype(jnp.bfloat16)

    def pack_affine(v):
        v = v.astype(jnp.float32)
        if pad:
            v = jnp.pad(v, (0, pad))
        return v.reshape(Cp, 1)

    w1m, w2m = pack_w(w1_hwio), pack_w(w2_hwio)
    g1p, b1p = pack_affine(g1), pack_affine(b1)
    g2p, b2p = pack_affine(g2), pack_affine(b2)

    # Per-tap circular lane shifts + bf16 border-validity masks (the conv zero
    # padding).  pltpu.roll follows the jnp.roll convention out[p] = in[p-shift],
    # so shift = -s yields patch[p] = x[p + s]; every wrapped lane is zeroed by
    # the border mask.
    pos = jnp.arange(HW)
    yy, xx = pos // W, pos % W
    shifts, rows = [], []
    for dy in (-1, 0, 1):
        for dx in (-1, 0, 1):
            s = dy * W + dx
            shifts.append((-s) % HW)
            rows.append((yy + dy >= 0) & (yy + dy < H)
                        & (xx + dx >= 0) & (xx + dx < W))
    masks = jnp.stack(rows, axis=0).astype(jnp.bfloat16)          # (9, HW)

    # --- samples per grid step ----------------------------------------------
    # Target ~1 MiB of activations per step (tiny per-step blocks leave the HBM
    # pipeline mostly idle), but keep >= 2 grid steps whenever B >= 2 so the
    # "parallel" axis can occupy both TensorCores on v7x.
    per_sample = Cp * HW * 4
    Bt = max(1, min(B, (1 << 20) // max(per_sample, 1)))
    while Bt > 1 and B // Bt < 2:
        Bt -= 1
    while B % Bt:
        Bt -= 1
    grid = (B // Bt,)

    # --- VMEM budget computed from the actual footprint ---------------------
    x_block = Bt * per_sample
    const_bytes = 2 * 9 * Cp * Cp * 2 + 9 * HW * 2 + 4 * Cp * 4
    live = 6 * Cp * HW * 4                    # rough per-sample f32 temporaries
    need = 2 * (2 * x_block) + 2 * const_bytes + Bt * live + (2 << 20)
    vmem_limit = int(min(max(need, 16 << 20), 100 << 20))

    kernel = _make_resblock_kernel(Bt, Cp, HW, Cg, tuple(shifts))

    # Grid-invariant operands: constant index maps -> fetched once, not
    # re-DMA'd across grid steps.
    const2 = lambda b: (0, 0)
    const3 = lambda b: (0, 0, 0)

    out = pl.pallas_call(
        kernel,
        out_shape=jax.ShapeDtypeStruct((B, Cp, HW), jnp.float32),
        grid=grid,
        in_specs=[
            pl.BlockSpec((Bt, Cp, HW), lambda b: (b, 0, 0)),   # x (Bt samples)
            pl.BlockSpec((9, Cp, Cp), const3),                 # conv1 taps (bf16)
            pl.BlockSpec((Cp, 1), const2),                     # norm1 gamma
            pl.BlockSpec((Cp, 1), const2),                     # norm1 beta
            pl.BlockSpec((9, Cp, Cp), const3),                 # conv2 taps (bf16)
            pl.BlockSpec((Cp, 1), const2),                     # norm2 gamma
            pl.BlockSpec((Cp, 1), const2),                     # norm2 beta
            pl.BlockSpec((9, HW), const2),                     # border masks (bf16)
        ],
        out_specs=pl.BlockSpec((Bt, Cp, HW), lambda b: (b, 0, 0)),
        compiler_params=pltpu.CompilerParams(
            dimension_semantics=("parallel",),
            vmem_limit_bytes=vmem_limit,
        ),
    )(x, w1m, g1p, b1p, w2m, g2p, b2p, masks)

    if pad:
        out = out[:, :C, :]
    return out.reshape(B, C, H, W)


# ---------------------------------------------------------------------------
# Pure-JAX reference (f32) mirroring the PyTorch module in eval mode
# ---------------------------------------------------------------------------
def _ref_forward(x_nchw, w1, g1, b1, w2, g2, b2):
    B, C, H, W = x_nchw.shape
    G = min(32, C)

    def gn(x, gamma, beta):
        xg = x.reshape(B, G, C // G, H, W)
        mean = xg.mean(axis=(2, 3, 4), keepdims=True)
        var = xg.var(axis=(2, 3, 4), keepdims=True)
        y = ((xg - mean) / jnp.sqrt(var + 1e-5)).reshape(B, C, H, W)
        return y * gamma[None, :, None, None] + beta[None, :, None, None]

    def conv(x, w_hwio):
        return jax.lax.conv_general_dilated(
            x, w_hwio, window_strides=(1, 1), padding="SAME",
            dimension_numbers=("NCHW", "HWIO", "NCHW"))

    out = jax.nn.relu(gn(x_nchw, g1, b1))
    out = conv(out, w1)
    out = jax.nn.relu(gn(out, g2, b2))
    out = conv(out, w2)
    return out + x_nchw


if __name__ == "__main__":
    # inplanes = planes = 4, stride = 1, eval mode.  B=4 so the kernel batches
    # Bt=2 samples per grid step while still running 2 parallel grid steps.
    B, C, H, W = 4, 4, 16, 16
    key = jax.random.PRNGKey(0)
    ks = jax.random.split(key, 7)
    x = jax.random.normal(ks[0], (B, C, H, W), jnp.float32)
    w1 = 0.1 * jax.random.normal(ks[1], (3, 3, C, C), jnp.float32)   # HWIO
    w2 = 0.1 * jax.random.normal(ks[2], (3, 3, C, C), jnp.float32)
    g1 = 1.0 + 0.1 * jax.random.normal(ks[3], (C,), jnp.float32)
    b1 = 0.1 * jax.random.normal(ks[4], (C,), jnp.float32)
    g2 = 1.0 + 0.1 * jax.random.normal(ks[5], (C,), jnp.float32)
    b2 = 0.1 * jax.random.normal(ks[6], (C,), jnp.float32)

    y = resblock_forward(x, w1, g1, b1, w2, g2, b2)
    y = jax.block_until_ready(y)

    y_ref = _ref_forward(x, w1, g1, b1, w2, g2, b2)
    assert y.shape == (B, C, H, W)
    err = float(jnp.max(jnp.abs(y - y_ref)))
    # bf16 matmul operands (f32 accumulation) vs a pure-f32 reference:
    # intentional inference-precision choice, hence the loose tolerance.
    assert jnp.allclose(y, y_ref, atol=5e-2, rtol=5e-2), f"max abs err = {err}"
    print("KERNEL_OK")
</pallas_src>

<mosaic_0001>
module attributes {stable_mosaic.version = 11 : i64} {
  func.func @kernel(%arg0: i32, %arg1: memref<2x8x256xf32, #tpu.memory_space<vmem>>, %arg2: memref<9x8x8xbf16, #tpu.memory_space<vmem>>, %arg3: memref<8x1xf32, #tpu.memory_space<vmem>>, %arg4: memref<8x1xf32, #tpu.memory_space<vmem>>, %arg5: memref<9x8x8xbf16, #tpu.memory_space<vmem>>, %arg6: memref<8x1xf32, #tpu.memory_space<vmem>>, %arg7: memref<8x1xf32, #tpu.memory_space<vmem>>, %arg8: memref<9x256xbf16, #tpu.memory_space<vmem>>, %arg9: memref<2x8x256xf32, #tpu.memory_space<vmem>>) attributes {dimension_semantics = [#tpu.dimension_semantics<parallel>], iteration_bounds = array<i64: 2>, scalar_prefetch = 0 : i64, scratch_operands = 0 : i64, tpu.core_type = #tpu.core_type<tc>, window_params = [{transform_indices = @transform_0, window_bounds = array<i64: 2, 8, 256>}, {pipeline_mode = #tpu.pipeline_mode<synchronous>, transform_indices = @transform_1, window_bounds = array<i64: 9, 8, 8>}, {pipeline_mode = #tpu.pipeline_mode<synchronous>, transform_indices = @transform_2, window_bounds = array<i64: 8, 1>}, {pipeline_mode = #tpu.pipeline_mode<synchronous>, transform_indices = @transform_3, window_bounds = array<i64: 8, 1>}, {pipeline_mode = #tpu.pipeline_mode<synchronous>, transform_indices = @transform_4, window_bounds = array<i64: 9, 8, 8>}, {pipeline_mode = #tpu.pipeline_mode<synchronous>, transform_indices = @transform_5, window_bounds = array<i64: 8, 1>}, {pipeline_mode = #tpu.pipeline_mode<synchronous>, transform_indices = @transform_6, window_bounds = array<i64: 8, 1>}, {pipeline_mode = #tpu.pipeline_mode<synchronous>, transform_indices = @transform_7, window_bounds = array<i64: 9, 256>}, {transform_indices = @transform_8, window_bounds = array<i64: 2, 8, 256>}]} {
    %c0 = arith.constant 0 : index
    %c0_0 = arith.constant 0 : index
    %0 = vector.load %arg8[%c0, %c0_0] : memref<9x256xbf16, #tpu.memory_space<vmem>>, vector<9x256xbf16>
    %1 = vector.extract_strided_slice %0 {offsets = [0, 0], sizes = [1, 256], strides = [1, 1]} : vector<9x256xbf16> to vector<1x256xbf16>
    %2 = vector.extract_strided_slice %0 {offsets = [1, 0], sizes = [1, 256], strides = [1, 1]} : vector<9x256xbf16> to vector<1x256xbf16>
    %3 = vector.extract_strided_slice %0 {offsets = [2, 0], sizes = [1, 256], strides = [1, 1]} : vector<9x256xbf16> to vector<1x256xbf16>
    %4 = vector.extract_strided_slice %0 {offsets = [3, 0], sizes = [1, 256], strides = [1, 1]} : vector<9x256xbf16> to vector<1x256xbf16>
    %5 = vector.extract_strided_slice %0 {offsets = [5, 0], sizes = [1, 256], strides = [1, 1]} : vector<9x256xbf16> to vector<1x256xbf16>
    %6 = vector.extract_strided_slice %0 {offsets = [6, 0], sizes = [1, 256], strides = [1, 1]} : vector<9x256xbf16> to vector<1x256xbf16>
    %7 = vector.extract_strided_slice %0 {offsets = [7, 0], sizes = [1, 256], strides = [1, 1]} : vector<9x256xbf16> to vector<1x256xbf16>
    %8 = vector.extract_strided_slice %0 {offsets = [8, 0], sizes = [1, 256], strides = [1, 1]} : vector<9x256xbf16> to vector<1x256xbf16>
    %c0_1 = arith.constant 0 : index
    %c0_2 = arith.constant 0 : index
    %9 = vector.load %arg3[%c0_1, %c0_2] : memref<8x1xf32, #tpu.memory_space<vmem>>, vector<8x1xf32>
    %c0_3 = arith.constant 0 : index
    %c0_4 = arith.constant 0 : index
    %10 = vector.load %arg4[%c0_3, %c0_4] : memref<8x1xf32, #tpu.memory_space<vmem>>, vector<8x1xf32>
    %c0_5 = arith.constant 0 : index
    %c0_6 = arith.constant 0 : index
    %11 = vector.load %arg6[%c0_5, %c0_6] : memref<8x1xf32, #tpu.memory_space<vmem>>, vector<8x1xf32>
    %c0_7 = arith.constant 0 : index
    %c0_8 = arith.constant 0 : index
    %12 = vector.load %arg7[%c0_7, %c0_8] : memref<8x1xf32, #tpu.memory_space<vmem>>, vector<8x1xf32>
    %c0_9 = arith.constant 0 : index
    %c0_10 = arith.constant 0 : index
    %c0_11 = arith.constant 0 : index
    %13 = vector.load %arg1[%c0_9, %c0_10, %c0_11] : memref<2x8x256xf32, #tpu.memory_space<vmem>>, vector<1x8x256xf32>
    %14 = vector.shape_cast %13 : vector<1x8x256xf32> to vector<8x256xf32>
    %cst = arith.constant dense<0.000000e+00> : vector<8xf32>
    %15 = vector.multi_reduction <add>, %14, %cst [1] : vector<8x256xf32> to vector<8xf32>
    %16 = vector.shape_cast %15 : vector<8xf32> to vector<8x1xf32>
    %cst_12 = arith.constant 3.906250e-03 : f32
    %17 = vector.broadcast %cst_12 : f32 to vector<8x1xf32>
    %18 = arith.mulf %16, %17 : vector<8x1xf32>
    %19 = vector.broadcast %18 : vector<8x1xf32> to vector<8x256xf32>
    %20 = arith.subf %14, %19 : vector<8x256xf32>
    %21 = arith.mulf %20, %20 : vector<8x256xf32>
    %cst_13 = arith.constant dense<0.000000e+00> : vector<8xf32>
    %22 = vector.multi_reduction <add>, %21, %cst_13 [1] : vector<8x256xf32> to vector<8xf32>
    %23 = vector.shape_cast %22 : vector<8xf32> to vector<8x1xf32>
    %cst_14 = arith.constant 3.906250e-03 : f32
    %24 = vector.broadcast %cst_14 : f32 to vector<8x1xf32>
    %25 = arith.mulf %23, %24 : vector<8x1xf32>
    %cst_15 = arith.constant 9.99999974E-6 : f32
    %26 = vector.broadcast %cst_15 : f32 to vector<8x1xf32>
    %27 = arith.addf %25, %26 : vector<8x1xf32>
    %28 = math.rsqrt %27 : vector<8x1xf32>
    %29 = arith.mulf %28, %9 : vector<8x1xf32>
    %30 = vector.broadcast %29 : vector<8x1xf32> to vector<8x256xf32>
    %31 = arith.mulf %20, %30 : vector<8x256xf32>
    %32 = vector.broadcast %10 : vector<8x1xf32> to vector<8x256xf32>
    %33 = arith.addf %31, %32 : vector<8x256xf32>
    %cst_16 = arith.constant 0.000000e+00 : f32
    %34 = vector.broadcast %cst_16 : f32 to vector<8x256xf32>
    %35 = arith.maximumf %33, %34 : vector<8x256xf32>
    %c17_i32 = arith.constant 17 : i32
    %36 = tpu.dynamic_rotate %35 by %c17_i32 dim 1 : vector<8x256xf32>, i32 -> vector<8x256xf32>
    %37 = arith.truncf %36 : vector<8x256xf32> to vector<8x256xbf16>
    %38 = vector.broadcast %1 : vector<1x256xbf16> to vector<8x256xbf16>
    %39 = arith.mulf %37, %38 : vector<8x256xbf16>
    %c0_17 = arith.constant 0 : index
    %c0_18 = arith.constant 0 : index
    %c0_19 = arith.constant 0 : index
    %40 = vector.load %arg2[%c0_17, %c0_18, %c0_19] : memref<9x8x8xbf16, #tpu.memory_space<vmem>>, vector<1x8x8xbf16>
    %41 = vector.shape_cast %40 : vector<1x8x8xbf16> to vector<8x8xbf16>
    %cst_20 = arith.constant dense<0.000000e+00> : vector<8x256xf32>
    %42 = tpu.matmul %41, %39, %cst_20 {dimension_numbers = #tpu.dot_dimension_numbers<[1], [0], [0], [1], [0, 0, 1, 1], [], []>} : vector<8x8xbf16>, vector<8x256xbf16>, vector<8x256xf32> -> vector<8x256xf32>
    %c16_i32 = arith.constant 16 : i32
    %43 = tpu.dynamic_rotate %35 by %c16_i32 dim 1 : vector<8x256xf32>, i32 -> vector<8x256xf32>
    %44 = arith.truncf %43 : vector<8x256xf32> to vector<8x256xbf16>
    %45 = vector.broadcast %2 : vector<1x256xbf16> to vector<8x256xbf16>
    %46 = arith.mulf %44, %45 : vector<8x256xbf16>
    %c1 = arith.constant 1 : index
    %c0_21 = arith.constant 0 : index
    %c0_22 = arith.constant 0 : index
    %47 = vector.load %arg2[%c1, %c0_21, %c0_22] : memref<9x8x8xbf16, #tpu.memory_space<vmem>>, vector<1x8x8xbf16>
    %48 = vector.shape_cast %47 : vector<1x8x8xbf16> to vector<8x8xbf16>
    %cst_23 = arith.constant dense<0.000000e+00> : vector<8x256xf32>
    %49 = tpu.matmul %48, %46, %cst_23 {dimension_numbers = #tpu.dot_dimension_numbers<[1], [0], [0], [1], [0, 0, 1, 1], [], []>} : vector<8x8xbf16>, vector<8x256xbf16>, vector<8x256xf32> -> vector<8x256xf32>
    %50 = arith.addf %42, %49 : vector<8x256xf32>
    %c15_i32 = arith.constant 15 : i32
    %51 = tpu.dynamic_rotate %35 by %c15_i32 dim 1 : vector<8x256xf32>, i32 -> vector<8x256xf32>
    %52 = arith.truncf %51 : vector<8x256xf32> to vector<8x256xbf16>
    %53 = vector.broadcast %3 : vector<1x256xbf16> to vector<8x256xbf16>
    %54 = arith.mulf %52, %53 : vector<8x256xbf16>
    %c2 = arith.constant 2 : index
    %c0_24 = arith.constant 0 : index
    %c0_25 = arith.constant 0 : index
    %55 = vector.load %arg2[%c2, %c0_24, %c0_25] : memref<9x8x8xbf16, #tpu.memory_space<vmem>>, vector<1x8x8xbf16>
    %56 = vector.shape_cast %55 : vector<1x8x8xbf16> to vector<8x8xbf16>
    %cst_26 = arith.constant dense<0.000000e+00> : vector<8x256xf32>
    %57 = tpu.matmul %56, %54, %cst_26 {dimension_numbers = #tpu.dot_dimension_numbers<[1], [0], [0], [1], [0, 0, 1, 1], [], []>} : vector<8x8xbf16>, vector<8x256xbf16>, vector<8x256xf32> -> vector<8x256xf32>
    %58 = arith.addf %50, %57 : vector<8x256xf32>
    %c1_i32 = arith.constant 1 : i32
    %59 = tpu.dynamic_rotate %35 by %c1_i32 dim 1 : vector<8x256xf32>, i32 -> vector<8x256xf32>
    %60 = arith.truncf %59 : vector<8x256xf32> to vector<8x256xbf16>
    %61 = vector.broadcast %4 : vector<1x256xbf16> to vector<8x256xbf16>
    %62 = arith.mulf %60, %61 : vector<8x256xbf16>
    %c3 = arith.constant 3 : index
    %c0_27 = arith.constant 0 : index
    %c0_28 = arith.constant 0 : index
    %63 = vector.load %arg2[%c3, %c0_27, %c0_28] : memref<9x8x8xbf16, #tpu.memory_space<vmem>>, vector<1x8x8xbf16>
    %64 = vector.shape_cast %63 : vector<1x8x8xbf16> to vector<8x8xbf16>
    %cst_29 = arith.constant dense<0.000000e+00> : vector<8x256xf32>
    %65 = tpu.matmul %64, %62, %cst_29 {dimension_numbers = #tpu.dot_dimension_numbers<[1], [0], [0], [1], [0, 0, 1, 1], [], []>} : vector<8x8xbf16>, vector<8x256xbf16>, vector<8x256xf32> -> vector<8x256xf32>
    %66 = arith.addf %58, %65 : vector<8x256xf32>
    %67 = arith.truncf %35 : vector<8x256xf32> to vector<8x256xbf16>
    %c4 = arith.constant 4 : index
    %c0_30 = arith.constant 0 : index
    %c0_31 = arith.constant 0 : index
    %68 = vector.load %arg2[%c4, %c0_30, %c0_31] : memref<9x8x8xbf16, #tpu.memory_space<vmem>>, vector<1x8x8xbf16>
    %69 = vector.shape_cast %68 : vector<1x8x8xbf16> to vector<8x8xbf16>
    %cst_32 = arith.constant dense<0.000000e+00> : vector<8x256xf32>
    %70 = tpu.matmul %69, %67, %cst_32 {dimension_numbers = #tpu.dot_dimension_numbers<[1], [0], [0], [1], [0, 0, 1, 1], [], []>} : vector<8x8xbf16>, vector<8x256xbf16>, vector<8x256xf32> -> vector<8x256xf32>
    %71 = arith.addf %66, %70 : vector<8x256xf32>
    %c255_i32 = arith.constant 255 : i32
    %72 = tpu.dynamic_rotate %35 by %c255_i32 dim 1 : vector<8x256xf32>, i32 -> vector<8x256xf32>
    %73 = arith.truncf %72 : vector<8x256xf32> to vector<8x256xbf16>
    %74 = vector.broadcast %5 : vector<1x256xbf16> to vector<8x256xbf16>
    %75 = arith.mulf %73, %74 : vector<8x256xbf16>
    %c5 = arith.constant 5 : index
    %c0_33 = arith.constant 0 : index
    %c0_34 = arith.constant 0 : index
    %76 = vector.load %arg2[%c5, %c0_33, %c0_34] : memref<9x8x8xbf16, #tpu.memory_space<vmem>>, vector<1x8x8xbf16>
    %77 = vector.shape_cast %76 : vector<1x8x8xbf16> to vector<8x8xbf16>
    %cst_35 = arith.constant dense<0.000000e+00> : vector<8x256xf32>
    %78 = tpu.matmul %77, %75, %cst_35 {dimension_numbers = #tpu.dot_dimension_numbers<[1], [0], [0], [1], [0, 0, 1, 1], [], []>} : vector<8x8xbf16>, vector<8x256xbf16>, vector<8x256xf32> -> vector<8x256xf32>
    %79 = arith.addf %71, %78 : vector<8x256xf32>
    %c241_i32 = arith.constant 241 : i32
    %80 = tpu.dynamic_rotate %35 by %c241_i32 dim 1 : vector<8x256xf32>, i32 -> vector<8x256xf32>
    %81 = arith.truncf %80 : vector<8x256xf32> to vector<8x256xbf16>
    %82 = vector.broadcast %6 : vector<1x256xbf16> to vector<8x256xbf16>
    %83 = arith.mulf %81, %82 : vector<8x256xbf16>
    %c6 = arith.constant 6 : index
    %c0_36 = arith.constant 0 : index
    %c0_37 = arith.constant 0 : index
    %84 = vector.load %arg2[%c6, %c0_36, %c0_37] : memref<9x8x8xbf16, #tpu.memory_space<vmem>>, vector<1x8x8xbf16>
    %85 = vector.shape_cast %84 : vector<1x8x8xbf16> to vector<8x8xbf16>
    %cst_38 = arith.constant dense<0.000000e+00> : vector<8x256xf32>
    %86 = tpu.matmul %85, %83, %cst_38 {dimension_numbers = #tpu.dot_dimension_numbers<[1], [0], [0], [1], [0, 0, 1, 1], [], []>} : vector<8x8xbf16>, vector<8x256xbf16>, vector<8x256xf32> -> vector<8x256xf32>
    %87 = arith.addf %79, %86 : vector<8x256xf32>
    %c240_i32 = arith.constant 240 : i32
    %88 = tpu.dynamic_rotate %35 by %c240_i32 dim 1 : vector<8x256xf32>, i32 -> vector<8x256xf32>
    %89 = arith.truncf %88 : vector<8x256xf32> to vector<8x256xbf16>
    %90 = vector.broadcast %7 : vector<1x256xbf16> to vector<8x256xbf16>
    %91 = arith.mulf %89, %90 : vector<8x256xbf16>
    %c7 = arith.constant 7 : index
    %c0_39 = arith.constant 0 : index
    %c0_40 = arith.constant 0 : index
    %92 = vector.load %arg2[%c7, %c0_39, %c0_40] : memref<9x8x8xbf16, #tpu.memory_space<vmem>>, vector<1x8x8xbf16>
    %93 = vector.shape_cast %92 : vector<1x8x8xbf16> to vector<8x8xbf16>
    %cst_41 = arith.constant dense<0.000000e+00> : vector<8x256xf32>
    %94 = tpu.matmul %93, %91, %cst_41 {dimension_numbers = #tpu.dot_dimension_numbers<[1], [0], [0], [1], [0, 0, 1, 1], [], []>} : vector<8x8xbf16>, vector<8x256xbf16>, vector<8x256xf32> -> vector<8x256xf32>
    %95 = arith.addf %87, %94 : vector<8x256xf32>
    %c239_i32 = arith.constant 239 : i32
    %96 = tpu.dynamic_rotate %35 by %c239_i32 dim 1 : vector<8x256xf32>, i32 -> vector<8x256xf32>
    %97 = arith.truncf %96 : vector<8x256xf32> to vector<8x256xbf16>
    %98 = vector.broadcast %8 : vector<1x256xbf16> to vector<8x256xbf16>
    %99 = arith.mulf %97, %98 : vector<8x256xbf16>
    %c8 = arith.constant 8 : index
    %c0_42 = arith.constant 0 : index
    %c0_43 = arith.constant 0 : index
    %100 = vector.load %arg2[%c8, %c0_42, %c0_43] : memref<9x8x8xbf16, #tpu.memory_space<vmem>>, vector<1x8x8xbf16>
    %101 = vector.shape_cast %100 : vector<1x8x8xbf16> to vector<8x8xbf16>
    %cst_44 = arith.constant dense<0.000000e+00> : vector<8x256xf32>
    %102 = tpu.matmul %101, %99, %cst_44 {dimension_numbers = #tpu.dot_dimension_numbers<[1], [0], [0], [1], [0, 0, 1, 1], [], []>} : vector<8x8xbf16>, vector<8x256xbf16>, vector<8x256xf32> -> vector<8x256xf32>
    %103 = arith.addf %95, %102 : vector<8x256xf32>
    %cst_45 = arith.constant dense<0.000000e+00> : vector<8xf32>
    %104 = vector.multi_reduction <add>, %103, %cst_45 [1] : vector<8x256xf32> to vector<8xf32>
    %105 = vector.shape_cast %104 : vector<8xf32> to vector<8x1xf32>
    %cst_46 = arith.constant 3.906250e-03 : f32
    %106 = vector.broadcast %cst_46 : f32 to vector<8x1xf32>
    %107 = arith.mulf %105, %106 : vector<8x1xf32>
    %108 = vector.broadcast %107 : vector<8x1xf32> to vector<8x256xf32>
    %109 = arith.subf %103, %108 : vector<8x256xf32>
    %110 = arith.mulf %109, %109 : vector<8x256xf32>
    %cst_47 = arith.constant dense<0.000000e+00> : vector<8xf32>
    %111 = vector.multi_reduction <add>, %110, %cst_47 [1] : vector<8x256xf32> to vector<8xf32>
    %112 = vector.shape_cast %111 : vector<8xf32> to vector<8x1xf32>
    %cst_48 = arith.constant 3.906250e-03 : f32
    %113 = vector.broadcast %cst_48 : f32 to vector<8x1xf32>
    %114 = arith.mulf %112, %113 : vector<8x1xf32>
    %cst_49 = arith.constant 9.99999974E-6 : f32
    %115 = vector.broadcast %cst_49 : f32 to vector<8x1xf32>
    %116 = arith.addf %114, %115 : vector<8x1xf32>
    %117 = math.rsqrt %116 : vector<8x1xf32>
    %118 = arith.mulf %117, %11 : vector<8x1xf32>
    %119 = vector.broadcast %118 : vector<8x1xf32> to vector<8x256xf32>
    %120 = arith.mulf %109, %119 : vector<8x256xf32>
    %121 = vector.broadcast %12 : vector<8x1xf32> to vector<8x256xf32>
    %122 = arith.addf %120, %121 : vector<8x256xf32>
    %cst_50 = arith.constant 0.000000e+00 : f32
    %123 = vector.broadcast %cst_50 : f32 to vector<8x256xf32>
    %124 = arith.maximumf %122, %123 : vector<8x256xf32>
    %c17_i32_51 = arith.constant 17 : i32
    %125 = tpu.dynamic_rotate %124 by %c17_i32_51 dim 1 : vector<8x256xf32>, i32 -> vector<8x256xf32>
    %126 = arith.truncf %125 : vector<8x256xf32> to vector<8x256xbf16>
    %127 = vector.broadcast %1 : vector<1x256xbf16> to vector<8x256xbf16>
    %128 = arith.mulf %126, %127 : vector<8x256xbf16>
    %c0_52 = arith.constant 0 : index
    %c0_53 = arith.constant 0 : index
    %c0_54 = arith.constant 0 : index
    %129 = vector.load %arg5[%c0_52, %c0_53, %c0_54] : memref<9x8x8xbf16, #tpu.memory_space<vmem>>, vector<1x8x8xbf16>
    %130 = vector.shape_cast %129 : vector<1x8x8xbf16> to vector<8x8xbf16>
    %cst_55 = arith.constant dense<0.000000e+00> : vector<8x256xf32>
    %131 = tpu.matmul %130, %128, %cst_55 {dimension_numbers = #tpu.dot_dimension_numbers<[1], [0], [0], [1], [0, 0, 1, 1], [], []>} : vector<8x8xbf16>, vector<8x256xbf16>, vector<8x256xf32> -> vector<8x256xf32>
    %c16_i32_56 = arith.constant 16 : i32
    %132 = tpu.dynamic_rotate %124 by %c16_i32_56 dim 1 : vector<8x256xf32>, i32 -> vector<8x256xf32>
    %133 = arith.truncf %132 : vector<8x256xf32> to vector<8x256xbf16>
    %134 = vector.broadcast %2 : vector<1x256xbf16> to vector<8x256xbf16>
    %135 = arith.mulf %133, %134 : vector<8x256xbf16>
    %c1_57 = arith.constant 1 : index
    %c0_58 = arith.constant 0 : index
    %c0_59 = arith.constant 0 : index
    %136 = vector.load %arg5[%c1_57, %c0_58, %c0_59] : memref<9x8x8xbf16, #tpu.memory_space<vmem>>, vector<1x8x8xbf16>
    %137 = vector.shape_cast %136 : vector<1x8x8xbf16> to vector<8x8xbf16>
    %cst_60 = arith.constant dense<0.000000e+00> : vector<8x256xf32>
    %138 = tpu.matmul %137, %135, %cst_60 {dimension_numbers = #tpu.dot_dimension_numbers<[1], [0], [0], [1], [0, 0, 1, 1], [], []>} : vector<8x8xbf16>, vector<8x256xbf16>, vector<8x256xf32> -> vector<8x256xf32>
    %139 = arith.addf %131, %138 : vector<8x256xf32>
    %c15_i32_61 = arith.constant 15 : i32
    %140 = tpu.dynamic_rotate %124 by %c15_i32_61 dim 1 : vector<8x256xf32>, i32 -> vector<8x256xf32>
    %141 = arith.truncf %140 : vector<8x256xf32> to vector<8x256xbf16>
    %142 = vector.broadcast %3 : vector<1x256xbf16> to vector<8x256xbf16>
    %143 = arith.mulf %141, %142 : vector<8x256xbf16>
    %c2_62 = arith.constant 2 : index
    %c0_63 = arith.constant 0 : index
    %c0_64 = arith.constant 0 : index
    %144 = vector.load %arg5[%c2_62, %c0_63, %c0_64] : memref<9x8x8xbf16, #tpu.memory_space<vmem>>, vector<1x8x8xbf16>
    %145 = vector.shape_cast %144 : vector<1x8x8xbf16> to vector<8x8xbf16>
    %cst_65 = arith.constant dense<0.000000e+00> : vector<8x256xf32>
    %146 = tpu.matmul %145, %143, %cst_65 {dimension_numbers = #tpu.dot_dimension_numbers<[1], [0], [0], [1], [0, 0, 1, 1], [], []>} : vector<8x8xbf16>, vector<8x256xbf16>, vector<8x256xf32> -> vector<8x256xf32>
    %147 = arith.addf %139, %146 : vector<8x256xf32>
    %c1_i32_66 = arith.constant 1 : i32
    %148 = tpu.dynamic_rotate %124 by %c1_i32_66 dim 1 : vector<8x256xf32>, i32 -> vector<8x256xf32>
    %149 = arith.truncf %148 : vector<8x256xf32> to vector<8x256xbf16>
    %150 = vector.broadcast %4 : vector<1x256xbf16> to vector<8x256xbf16>
    %151 = arith.mulf %149, %150 : vector<8x256xbf16>
    %c3_67 = arith.constant 3 : index
    %c0_68 = arith.constant 0 : index
    %c0_69 = arith.constant 0 : index
    %152 = vector.load %arg5[%c3_67, %c0_68, %c0_69] : memref<9x8x8xbf16, #tpu.memory_space<vmem>>, vector<1x8x8xbf16>
    %153 = vector.shape_cast %152 : vector<1x8x8xbf16> to vector<8x8xbf16>
    %cst_70 = arith.constant dense<0.000000e+00> : vector<8x256xf32>
    %154 = tpu.matmul %153, %151, %cst_70 {dimension_numbers = #tpu.dot_dimension_numbers<[1], [0], [0], [1], [0, 0, 1, 1], [], []>} : vector<8x8xbf16>, vector<8x256xbf16>, vector<8x256xf32> -> vector<8x256xf32>
    %155 = arith.addf %147, %154 : vector<8x256xf32>
    %156 = arith.truncf %124 : vector<8x256xf32> to vector<8x256xbf16>
    %c4_71 = arith.constant 4 : index
    %c0_72 = arith.constant 0 : index
    %c0_73 = arith.constant 0 : index
    %157 = vector.load %arg5[%c4_71, %c0_72, %c0_73] : memref<9x8x8xbf16, #tpu.memory_space<vmem>>, vector<1x8x8xbf16>
    %158 = vector.shape_cast %157 : vector<1x8x8xbf16> to vector<8x8xbf16>
    %cst_74 = arith.constant dense<0.000000e+00> : vector<8x256xf32>
    %159 = tpu.matmul %158, %156, %cst_74 {dimension_numbers = #tpu.dot_dimension_numbers<[1], [0], [0], [1], [0, 0, 1, 1], [], []>} : vector<8x8xbf16>, vector<8x256xbf16>, vector<8x256xf32> -> vector<8x256xf32>
    %160 = arith.addf %155, %159 : vector<8x256xf32>
    %c255_i32_75 = arith.constant 255 : i32
    %161 = tpu.dynamic_rotate %124 by %c255_i32_75 dim 1 : vector<8x256xf32>, i32 -> vector<8x256xf32>
    %162 = arith.truncf %161 : vector<8x256xf32> to vector<8x256xbf16>
    %163 = vector.broadcast %5 : vector<1x256xbf16> to vector<8x256xbf16>
    %164 = arith.mulf %162, %163 : vector<8x256xbf16>
    %c5_76 = arith.constant 5 : index
    %c0_77 = arith.constant 0 : index
    %c0_78 = arith.constant 0 : index
    %165 = vector.load %arg5[%c5_76, %c0_77, %c0_78] : memref<9x8x8xbf16, #tpu.memory_space<vmem>>, vector<1x8x8xbf16>
    %166 = vector.shape_cast %165 : vector<1x8x8xbf16> to vector<8x8xbf16>
    %cst_79 = arith.constant dense<0.000000e+00> : vector<8x256xf32>
    %167 = tpu.matmul %166, %164, %cst_79 {dimension_numbers = #tpu.dot_dimension_numbers<[1], [0], [0], [1], [0, 0, 1, 1], [], []>} : vector<8x8xbf16>, vector<8x256xbf16>, vector<8x256xf32> -> vector<8x256xf32>
    %168 = arith.addf %160, %167 : vector<8x256xf32>
    %c241_i32_80 = arith.constant 241 : i32
    %169 = tpu.dynamic_rotate %124 by %c241_i32_80 dim 1 : vector<8x256xf32>, i32 -> vector<8x256xf32>
    %170 = arith.truncf %169 : vector<8x256xf32> to vector<8x256xbf16>
    %171 = vector.broadcast %6 : vector<1x256xbf16> to vector<8x256xbf16>
    %172 = arith.mulf %170, %171 : vector<8x256xbf16>
    %c6_81 = arith.constant 6 : index
    %c0_82 = arith.constant 0 : index
    %c0_83 = arith.constant 0 : index
    %173 = vector.load %arg5[%c6_81, %c0_82, %c0_83] : memref<9x8x8xbf16, #tpu.memory_space<vmem>>, vector<1x8x8xbf16>
    %174 = vector.shape_cast %173 : vector<1x8x8xbf16> to vector<8x8xbf16>
    %cst_84 = arith.constant dense<0.000000e+00> : vector<8x256xf32>
    %175 = tpu.matmul %174, %172, %cst_84 {dimension_numbers = #tpu.dot_dimension_numbers<[1], [0], [0], [1], [0, 0, 1, 1], [], []>} : vector<8x8xbf16>, vector<8x256xbf16>, vector<8x256xf32> -> vector<8x256xf32>
    %176 = arith.addf %168, %175 : vector<8x256xf32>
    %c240_i32_85 = arith.constant 240 : i32
    %177 = tpu.dynamic_rotate %124 by %c240_i32_85 dim 1 : vector<8x256xf32>, i32 -> vector<8x256xf32>
    %178 = arith.truncf %177 : vector<8x256xf32> to vector<8x256xbf16>
    %179 = vector.broadcast %7 : vector<1x256xbf16> to vector<8x256xbf16>
    %180 = arith.mulf %178, %179 : vector<8x256xbf16>
    %c7_86 = arith.constant 7 : index
    %c0_87 = arith.constant 0 : index
    %c0_88 = arith.constant 0 : index
    %181 = vector.load %arg5[%c7_86, %c0_87, %c0_88] : memref<9x8x8xbf16, #tpu.memory_space<vmem>>, vector<1x8x8xbf16>
    %182 = vector.shape_cast %181 : vector<1x8x8xbf16> to vector<8x8xbf16>
    %cst_89 = arith.constant dense<0.000000e+00> : vector<8x256xf32>
    %183 = tpu.matmul %182, %180, %cst_89 {dimension_numbers = #tpu.dot_dimension_numbers<[1], [0], [0], [1], [0, 0, 1, 1], [], []>} : vector<8x8xbf16>, vector<8x256xbf16>, vector<8x256xf32> -> vector<8x256xf32>
    %184 = arith.addf %176, %183 : vector<8x256xf32>
    %c239_i32_90 = arith.constant 239 : i32
    %185 = tpu.dynamic_rotate %124 by %c239_i32_90 dim 1 : vector<8x256xf32>, i32 -> vector<8x256xf32>
    %186 = arith.truncf %185 : vector<8x256xf32> to vector<8x256xbf16>
    %187 = vector.broadcast %8 : vector<1x256xbf16> to vector<8x256xbf16>
    %188 = arith.mulf %186, %187 : vector<8x256xbf16>
    %c8_91 = arith.constant 8 : index
    %c0_92 = arith.constant 0 : index
    %c0_93 = arith.constant 0 : index
    %189 = vector.load %arg5[%c8_91, %c0_92, %c0_93] : memref<9x8x8xbf16, #tpu.memory_space<vmem>>, vector<1x8x8xbf16>
    %190 = vector.shape_cast %189 : vector<1x8x8xbf16> to vector<8x8xbf16>
    %cst_94 = arith.constant dense<0.000000e+00> : vector<8x256xf32>
    %191 = tpu.matmul %190, %188, %cst_94 {dimension_numbers = #tpu.dot_dimension_numbers<[1], [0], [0], [1], [0, 0, 1, 1], [], []>} : vector<8x8xbf16>, vector<8x256xbf16>, vector<8x256xf32> -> vector<8x256xf32>
    %192 = arith.addf %184, %191 : vector<8x256xf32>
    %c0_95 = arith.constant 0 : index
    %c0_96 = arith.constant 0 : index
    %c0_97 = arith.constant 0 : index
    %193 = vector.load %arg1[%c0_95, %c0_96, %c0_97] : memref<2x8x256xf32, #tpu.memory_space<vmem>>, vector<1x8x256xf32>
    %194 = vector.shape_cast %193 : vector<1x8x256xf32> to vector<8x256xf32>
    %195 = arith.addf %192, %194 : vector<8x256xf32>
    %c0_98 = arith.constant 0 : index
    %c0_99 = arith.constant 0 : index
    %c0_100 = arith.constant 0 : index
    %196 = vector.load %arg9[%c0_98, %c0_99, %c0_100] : memref<2x8x256xf32, #tpu.memory_space<vmem>>, vector<1x8x256xf32>
    %197 = vector.shape_cast %196 : vector<1x8x256xf32> to vector<8x256xf32>
    %198 = vector.shape_cast %195 : vector<8x256xf32> to vector<1x8x256xf32>
    tpu.vector_store %arg9[%c0_98, %c0_99, %c0_100], %198 {strides = array<i32>} : memref<2x8x256xf32, #tpu.memory_space<vmem>>, vector<1x8x256xf32>,
    %c1_101 = arith.constant 1 : index
    %c0_102 = arith.constant 0 : index
    %c0_103 = arith.constant 0 : index
    %199 = vector.load %arg1[%c1_101, %c0_102, %c0_103] : memref<2x8x256xf32, #tpu.memory_space<vmem>>, vector<1x8x256xf32>
    %200 = vector.shape_cast %199 : vector<1x8x256xf32> to vector<8x256xf32>
    %cst_104 = arith.constant dense<0.000000e+00> : vector<8xf32>
    %201 = vector.multi_reduction <add>, %200, %cst_104 [1] : vector<8x256xf32> to vector<8xf32>
    %202 = vector.shape_cast %201 : vector<8xf32> to vector<8x1xf32>
    %cst_105 = arith.constant 3.906250e-03 : f32
    %203 = vector.broadcast %cst_105 : f32 to vector<8x1xf32>
    %204 = arith.mulf %202, %203 : vector<8x1xf32>
    %205 = vector.broadcast %204 : vector<8x1xf32> to vector<8x256xf32>
    %206 = arith.subf %200, %205 : vector<8x256xf32>
    %207 = arith.mulf %206, %206 : vector<8x256xf32>
    %cst_106 = arith.constant dense<0.000000e+00> : vector<8xf32>
    %208 = vector.multi_reduction <add>, %207, %cst_106 [1] : vector<8x256xf32> to vector<8xf32>
    %209 = vector.shape_cast %208 : vector<8xf32> to vector<8x1xf32>
    %cst_107 = arith.constant 3.906250e-03 : f32
    %210 = vector.broadcast %cst_107 : f32 to vector<8x1xf32>
    %211 = arith.mulf %209, %210 : vector<8x1xf32>
    %cst_108 = arith.constant 9.99999974E-6 : f32
    %212 = vector.broadcast %cst_108 : f32 to vector<8x1xf32>
    %213 = arith.addf %211, %212 : vector<8x1xf32>
    %214 = math.rsqrt %213 : vector<8x1xf32>
    %215 = arith.mulf %214, %9 : vector<8x1xf32>
    %216 = vector.broadcast %215 : vector<8x1xf32> to vector<8x256xf32>
    %217 = arith.mulf %206, %216 : vector<8x256xf32>
    %218 = vector.broadcast %10 : vector<8x1xf32> to vector<8x256xf32>
    %219 = arith.addf %217, %218 : vector<8x256xf32>
    %cst_109 = arith.constant 0.000000e+00 : f32
    %220 = vector.broadcast %cst_109 : f32 to vector<8x256xf32>
    %221 = arith.maximumf %219, %220 : vector<8x256xf32>
    %c17_i32_110 = arith.constant 17 : i32
    %222 = tpu.dynamic_rotate %221 by %c17_i32_110 dim 1 : vector<8x256xf32>, i32 -> vector<8x256xf32>
    %223 = arith.truncf %222 : vector<8x256xf32> to vector<8x256xbf16>
    %224 = vector.broadcast %1 : vector<1x256xbf16> to vector<8x256xbf16>
    %225 = arith.mulf %223, %224 : vector<8x256xbf16>
    %c0_111 = arith.constant 0 : index
    %c0_112 = arith.constant 0 : index
    %c0_113 = arith.constant 0 : index
    %226 = vector.load %arg2[%c0_111, %c0_112, %c0_113] : memref<9x8x8xbf16, #tpu.memory_space<vmem>>, vector<1x8x8xbf16>
    %227 = vector.shape_cast %226 : vector<1x8x8xbf16> to vector<8x8xbf16>
    %cst_114 = arith.constant dense<0.000000e+00> : vector<8x256xf32>
    %228 = tpu.matmul %227, %225, %cst_114 {dimension_numbers = #tpu.dot_dimension_numbers<[1], [0], [0], [1], [0, 0, 1, 1], [], []>} : vector<8x8xbf16>, vector<8x256xbf16>, vector<8x256xf32> -> vector<8x256xf32>
    %c16_i32_115 = arith.constant 16 : i32
    %229 = tpu.dynamic_rotate %221 by %c16_i32_115 dim 1 : vector<8x256xf32>, i32 -> vector<8x256xf32>
    %230 = arith.truncf %229 : vector<8x256xf32> to vector<8x256xbf16>
    %231 = vector.broadcast %2 : vector<1x256xbf16> to vector<8x256xbf16>
    %232 = arith.mulf %230, %231 : vector<8x256xbf16>
    %c1_116 = arith.constant 1 : index
    %c0_117 = arith.constant 0 : index
    %c0_118 = arith.constant 0 : index
    %233 = vector.load %arg2[%c1_116, %c0_117, %c0_118] : memref<9x8x8xbf16, #tpu.memory_space<vmem>>, vector<1x8x8xbf16>
    %234 = vector.shape_cast %233 : vector<1x8x8xbf16> to vector<8x8xbf16>
    %cst_119 = arith.constant dense<0.000000e+00> : vector<8x256xf32>
    %235 = tpu.matmul %234, %232, %cst_119 {dimension_numbers = #tpu.dot_dimension_numbers<[1], [0], [0], [1], [0, 0, 1, 1], [], []>} : vector<8x8xbf16>, vector<8x256xbf16>, vector<8x256xf32> -> vector<8x256xf32>
    %236 = arith.addf %228, %235 : vector<8x256xf32>
    %c15_i32_120 = arith.constant 15 : i32
    %237 = tpu.dynamic_rotate %221 by %c15_i32_120 dim 1 : vector<8x256xf32>, i32 -> vector<8x256xf32>
    %238 = arith.truncf %237 : vector<8x256xf32> to vector<8x256xbf16>
    %239 = vector.broadcast %3 : vector<1x256xbf16> to vector<8x256xbf16>
    %240 = arith.mulf %238, %239 : vector<8x256xbf16>
    %c2_121 = arith.constant 2 : index
    %c0_122 = arith.constant 0 : index
    %c0_123 = arith.constant 0 : index
    %241 = vector.load %arg2[%c2_121, %c0_122, %c0_123] : memref<9x8x8xbf16, #tpu.memory_space<vmem>>, vector<1x8x8xbf16>
    %242 = vector.shape_cast %241 : vector<1x8x8xbf16> to vector<8x8xbf16>
    %cst_124 = arith.constant dense<0.000000e+00> : vector<8x256xf32>
    %243 = tpu.matmul %242, %240, %cst_124 {dimension_numbers = #tpu.dot_dimension_numbers<[1], [0], [0], [1], [0, 0, 1, 1], [], []>} : vector<8x8xbf16>, vector<8x256xbf16>, vector<8x256xf32> -> vector<8x256xf32>
    %244 = arith.addf %236, %243 : vector<8x256xf32>
    %c1_i32_125 = arith.constant 1 : i32
    %245 = tpu.dynamic_rotate %221 by %c1_i32_125 dim 1 : vector<8x256xf32>, i32 -> vector<8x256xf32>
    %246 = arith.truncf %245 : vector<8x256xf32> to vector<8x256xbf16>
    %247 = vector.broadcast %4 : vector<1x256xbf16> to vector<8x256xbf16>
    %248 = arith.mulf %246, %247 : vector<8x256xbf16>
    %c3_126 = arith.constant 3 : index
    %c0_127 = arith.constant 0 : index
    %c0_128 = arith.constant 0 : index
    %249 = vector.load %arg2[%c3_126, %c0_127, %c0_128] : memref<9x8x8xbf16, #tpu.memory_space<vmem>>, vector<1x8x8xbf16>
    %250 = vector.shape_cast %249 : vector<1x8x8xbf16> to vector<8x8xbf16>
    %cst_129 = arith.constant dense<0.000000e+00> : vector<8x256xf32>
    %251 = tpu.matmul %250, %248, %cst_129 {dimension_numbers = #tpu.dot_dimension_numbers<[1], [0], [0], [1], [0, 0, 1, 1], [], []>} : vector<8x8xbf16>, vector<8x256xbf16>, vector<8x256xf32> -> vector<8x256xf32>
    %252 = arith.addf %244, %251 : vector<8x256xf32>
    %253 = arith.truncf %221 : vector<8x256xf32> to vector<8x256xbf16>
    %c4_130 = arith.constant 4 : index
    %c0_131 = arith.constant 0 : index
    %c0_132 = arith.constant 0 : index
    %254 = vector.load %arg2[%c4_130, %c0_131, %c0_132] : memref<9x8x8xbf16, #tpu.memory_space<vmem>>, vector<1x8x8xbf16>
    %255 = vector.shape_cast %254 : vector<1x8x8xbf16> to vector<8x8xbf16>
    %cst_133 = arith.constant dense<0.000000e+00> : vector<8x256xf32>
    %256 = tpu.matmul %255, %253, %cst_133 {dimension_numbers = #tpu.dot_dimension_numbers<[1], [0], [0], [1], [0, 0, 1, 1], [], []>} : vector<8x8xbf16>, vector<8x256xbf16>, vector<8x256xf32> -> vector<8x256xf32>
    %257 = arith.addf %252, %256 : vector<8x256xf32>
    %c255_i32_134 = arith.constant 255 : i32
    %258 = tpu.dynamic_rotate %221 by %c255_i32_134 dim 1 : vector<8x256xf32>, i32 -> vector<8x256xf32>
    %259 = arith.truncf %258 : vector<8x256xf32> to vector<8x256xbf16>
    %260 = vector.broadcast %5 : vector<1x256xbf16> to vector<8x256xbf16>
    %261 = arith.mulf %259, %260 : vector<8x256xbf16>
    %c5_135 = arith.constant 5 : index
    %c0_136 = arith.constant 0 : index
    %c0_137 = arith.constant 0 : index
    %262 = vector.load %arg2[%c5_135, %c0_136, %c0_137] : memref<9x8x8xbf16, #tpu.memory_space<vmem>>, vector<1x8x8xbf16>
    %263 = vector.shape_cast %262 : vector<1x8x8xbf16> to vector<8x8xbf16>
    %cst_138 = arith.constant dense<0.000000e+00> : vector<8x256xf32>
    %264 = tpu.matmul %263, %261, %cst_138 {dimension_numbers = #tpu.dot_dimension_numbers<[1], [0], [0], [1], [0, 0, 1, 1], [], []>} : vector<8x8xbf16>, vector<8x256xbf16>, vector<8x256xf32> -> vector<8x256xf32>
    %265 = arith.addf %257, %264 : vector<8x256xf32>
    %c241_i32_139 = arith.constant 241 : i32
    %266 = tpu.dynamic_rotate %221 by %c241_i32_139 dim 1 : vector<8x256xf32>, i32 -> vector<8x256xf32>
    %267 = arith.truncf %266 : vector<8x256xf32> to vector<8x256xbf16>
    %268 = vector.broadcast %6 : vector<1x256xbf16> to vector<8x256xbf16>
    %269 = arith.mulf %267, %268 : vector<8x256xbf16>
    %c6_140 = arith.constant 6 : index
    %c0_141 = arith.constant 0 : index
    %c0_142 = arith.constant 0 : index
    %270 = vector.load %arg2[%c6_140, %c0_141, %c0_142] : memref<9x8x8xbf16, #tpu.memory_space<vmem>>, vector<1x8x8xbf16>
    %271 = vector.shape_cast %270 : vector<1x8x8xbf16> to vector<8x8xbf16>
    %cst_143 = arith.constant dense<0.000000e+00> : vector<8x256xf32>
    %272 = tpu.matmul %271, %269, %cst_143 {dimension_numbers = #tpu.dot_dimension_numbers<[1], [0], [0], [1], [0, 0, 1, 1], [], []>} : vector<8x8xbf16>, vector<8x256xbf16>, vector<8x256xf32> -> vector<8x256xf32>
    %273 = arith.addf %265, %272 : vector<8x256xf32>
    %c240_i32_144 = arith.constant 240 : i32
    %274 = tpu.dynamic_rotate %221 by %c240_i32_144 dim 1 : vector<8x256xf32>, i32 -> vector<8x256xf32>
    %275 = arith.truncf %274 : vector<8x256xf32> to vector<8x256xbf16>
    %276 = vector.broadcast %7 : vector<1x256xbf16> to vector<8x256xbf16>
    %277 = arith.mulf %275, %276 : vector<8x256xbf16>
    %c7_145 = arith.constant 7 : index
    %c0_146 = arith.constant 0 : index
    %c0_147 = arith.constant 0 : index
    %278 = vector.load %arg2[%c7_145, %c0_146, %c0_147] : memref<9x8x8xbf16, #tpu.memory_space<vmem>>, vector<1x8x8xbf16>
    %279 = vector.shape_cast %278 : vector<1x8x8xbf16> to vector<8x8xbf16>
    %cst_148 = arith.constant dense<0.000000e+00> : vector<8x256xf32>
    %280 = tpu.matmul %279, %277, %cst_148 {dimension_numbers = #tpu.dot_dimension_numbers<[1], [0], [0], [1], [0, 0, 1, 1], [], []>} : vector<8x8xbf16>, vector<8x256xbf16>, vector<8x256xf32> -> vector<8x256xf32>
    %281 = arith.addf %273, %280 : vector<8x256xf32>
    %c239_i32_149 = arith.constant 239 : i32
    %282 = tpu.dynamic_rotate %221 by %c239_i32_149 dim 1 : vector<8x256xf32>, i32 -> vector<8x256xf32>
    %283 = arith.truncf %282 : vector<8x256xf32> to vector<8x256xbf16>
    %284 = vector.broadcast %8 : vector<1x256xbf16> to vector<8x256xbf16>
    %285 = arith.mulf %283, %284 : vector<8x256xbf16>
    %c8_150 = arith.constant 8 : index
    %c0_151 = arith.constant 0 : index
    %c0_152 = arith.constant 0 : index
    %286 = vector.load %arg2[%c8_150, %c0_151, %c0_152] : memref<9x8x8xbf16, #tpu.memory_space<vmem>>, vector<1x8x8xbf16>
    %287 = vector.shape_cast %286 : vector<1x8x8xbf16> to vector<8x8xbf16>
    %cst_153 = arith.constant dense<0.000000e+00> : vector<8x256xf32>
    %288 = tpu.matmul %287, %285, %cst_153 {dimension_numbers = #tpu.dot_dimension_numbers<[1], [0], [0], [1], [0, 0, 1, 1], [], []>} : vector<8x8xbf16>, vector<8x256xbf16>, vector<8x256xf32> -> vector<8x256xf32>
    %289 = arith.addf %281, %288 : vector<8x256xf32>
    %cst_154 = arith.constant dense<0.000000e+00> : vector<8xf32>
    %290 = vector.multi_reduction <add>, %289, %cst_154 [1] : vector<8x256xf32> to vector<8xf32>
    %291 = vector.shape_cast %290 : vector<8xf32> to vector<8x1xf32>
    %cst_155 = arith.constant 3.906250e-03 : f32
    %292 = vector.broadcast %cst_155 : f32 to vector<8x1xf32>
    %293 = arith.mulf %291, %292 : vector<8x1xf32>
    %294 = vector.broadcast %293 : vector<8x1xf32> to vector<8x256xf32>
    %295 = arith.subf %289, %294 : vector<8x256xf32>
    %296 = arith.mulf %295, %295 : vector<8x256xf32>
    %cst_156 = arith.constant dense<0.000000e+00> : vector<8xf32>
    %297 = vector.multi_reduction <add>, %296, %cst_156 [1] : vector<8x256xf32> to vector<8xf32>
    %298 = vector.shape_cast %297 : vector<8xf32> to vector<8x1xf32>
    %cst_157 = arith.constant 3.906250e-03 : f32
    %299 = vector.broadcast %cst_157 : f32 to vector<8x1xf32>
    %300 = arith.mulf %298, %299 : vector<8x1xf32>
    %cst_158 = arith.constant 9.99999974E-6 : f32
    %301 = vector.broadcast %cst_158 : f32 to vector<8x1xf32>
    %302 = arith.addf %300, %301 : vector<8x1xf32>
    %303 = math.rsqrt %302 : vector<8x1xf32>
    %304 = arith.mulf %303, %11 : vector<8x1xf32>
    %305 = vector.broadcast %304 : vector<8x1xf32> to vector<8x256xf32>
    %306 = arith.mulf %295, %305 : vector<8x256xf32>
    %307 = vector.broadcast %12 : vector<8x1xf32> to vector<8x256xf32>
    %308 = arith.addf %306, %307 : vector<8x256xf32>
    %cst_159 = arith.constant 0.000000e+00 : f32
    %309 = vector.broadcast %cst_159 : f32 to vector<8x256xf32>
    %310 = arith.maximumf %308, %309 : vector<8x256xf32>
    %c17_i32_160 = arith.constant 17 : i32
    %311 = tpu.dynamic_rotate %310 by %c17_i32_160 dim 1 : vector<8x256xf32>, i32 -> vector<8x256xf32>
    %312 = arith.truncf %311 : vector<8x256xf32> to vector<8x256xbf16>
    %313 = vector.broadcast %1 : vector<1x256xbf16> to vector<8x256xbf16>
    %314 = arith.mulf %312, %313 : vector<8x256xbf16>
    %c0_161 = arith.constant 0 : index
    %c0_162 = arith.constant 0 : index
    %c0_163 = arith.constant 0 : index
    %315 = vector.load %arg5[%c0_161, %c0_162, %c0_163] : memref<9x8x8xbf16, #tpu.memory_space<vmem>>, vector<1x8x8xbf16>
    %316 = vector.shape_cast %315 : vector<1x8x8xbf16> to vector<8x8xbf16>
    %cst_164 = arith.constant dense<0.000000e+00> : vector<8x256xf32>
    %317 = tpu.matmul %316, %314, %cst_164 {dimension_numbers = #tpu.dot_dimension_numbers<[1], [0], [0], [1], [0, 0, 1, 1], [], []>} : vector<8x8xbf16>, vector<8x256xbf16>, vector<8x256xf32> -> vector<8x256xf32>
    %c16_i32_165 = arith.constant 16 : i32
    %318 = tpu.dynamic_rotate %310 by %c16_i32_165 dim 1 : vector<8x256xf32>, i32 -> vector<8x256xf32>
    %319 = arith.truncf %318 : vector<8x256xf32> to vector<8x256xbf16>
    %320 = vector.broadcast %2 : vector<1x256xbf16> to vector<8x256xbf16>
    %321 = arith.mulf %319, %320 : vector<8x256xbf16>
    %c1_166 = arith.constant 1 : index
    %c0_167 = arith.constant 0 : index
    %c0_168 = arith.constant 0 : index
    %322 = vector.load %arg5[%c1_166, %c0_167, %c0_168] : memref<9x8x8xbf16, #tpu.memory_space<vmem>>, vector<1x8x8xbf16>
    %323 = vector.shape_cast %322 : vector<1x8x8xbf16> to vector<8x8xbf16>
    %cst_169 = arith.constant dense<0.000000e+00> : vector<8x256xf32>
    %324 = tpu.matmul %323, %321, %cst_169 {dimension_numbers = #tpu.dot_dimension_numbers<[1], [0], [0], [1], [0, 0, 1, 1], [], []>} : vector<8x8xbf16>, vector<8x256xbf16>, vector<8x256xf32> -> vector<8x256xf32>
    %325 = arith.addf %317, %324 : vector<8x256xf32>
    %c15_i32_170 = arith.constant 15 : i32
    %326 = tpu.dynamic_rotate %310 by %c15_i32_170 dim 1 : vector<8x256xf32>, i32 -> vector<8x256xf32>
    %327 = arith.truncf %326 : vector<8x256xf32> to vector<8x256xbf16>
    %328 = vector.broadcast %3 : vector<1x256xbf16> to vector<8x256xbf16>
    %329 = arith.mulf %327, %328 : vector<8x256xbf16>
    %c2_171 = arith.constant 2 : index
    %c0_172 = arith.constant 0 : index
    %c0_173 = arith.constant 0 : index
    %330 = vector.load %arg5[%c2_171, %c0_172, %c0_173] : memref<9x8x8xbf16, #tpu.memory_space<vmem>>, vector<1x8x8xbf16>
    %331 = vector.shape_cast %330 : vector<1x8x8xbf16> to vector<8x8xbf16>
    %cst_174 = arith.constant dense<0.000000e+00> : vector<8x256xf32>
    %332 = tpu.matmul %331, %329, %cst_174 {dimension_numbers = #tpu.dot_dimension_numbers<[1], [0], [0], [1], [0, 0, 1, 1], [], []>} : vector<8x8xbf16>, vector<8x256xbf16>, vector<8x256xf32> -> vector<8x256xf32>
    %333 = arith.addf %325, %332 : vector<8x256xf32>
    %c1_i32_175 = arith.constant 1 : i32
    %334 = tpu.dynamic_rotate %310 by %c1_i32_175 dim 1 : vector<8x256xf32>, i32 -> vector<8x256xf32>
    %335 = arith.truncf %334 : vector<8x256xf32> to vector<8x256xbf16>
    %336 = vector.broadcast %4 : vector<1x256xbf16> to vector<8x256xbf16>
    %337 = arith.mulf %335, %336 : vector<8x256xbf16>
    %c3_176 = arith.constant 3 : index
    %c0_177 = arith.constant 0 : index
    %c0_178 = arith.constant 0 : index
    %338 = vector.load %arg5[%c3_176, %c0_177, %c0_178] : memref<9x8x8xbf16, #tpu.memory_space<vmem>>, vector<1x8x8xbf16>
    %339 = vector.shape_cast %338 : vector<1x8x8xbf16> to vector<8x8xbf16>
    %cst_179 = arith.constant dense<0.000000e+00> : vector<8x256xf32>
    %340 = tpu.matmul %339, %337, %cst_179 {dimension_numbers = #tpu.dot_dimension_numbers<[1], [0], [0], [1], [0, 0, 1, 1], [], []>} : vector<8x8xbf16>, vector<8x256xbf16>, vector<8x256xf32> -> vector<8x256xf32>
    %341 = arith.addf %333, %340 : vector<8x256xf32>
    %342 = arith.truncf %310 : vector<8x256xf32> to vector<8x256xbf16>
    %c4_180 = arith.constant 4 : index
    %c0_181 = arith.constant 0 : index
    %c0_182 = arith.constant 0 : index
    %343 = vector.load %arg5[%c4_180, %c0_181, %c0_182] : memref<9x8x8xbf16, #tpu.memory_space<vmem>>, vector<1x8x8xbf16>
    %344 = vector.shape_cast %343 : vector<1x8x8xbf16> to vector<8x8xbf16>
    %cst_183 = arith.constant dense<0.000000e+00> : vector<8x256xf32>
    %345 = tpu.matmul %344, %342, %cst_183 {dimension_numbers = #tpu.dot_dimension_numbers<[1], [0], [0], [1], [0, 0, 1, 1], [], []>} : vector<8x8xbf16>, vector<8x256xbf16>, vector<8x256xf32> -> vector<8x256xf32>
    %346 = arith.addf %341, %345 : vector<8x256xf32>
    %c255_i32_184 = arith.constant 255 : i32
    %347 = tpu.dynamic_rotate %310 by %c255_i32_184 dim 1 : vector<8x256xf32>, i32 -> vector<8x256xf32>
    %348 = arith.truncf %347 : vector<8x256xf32> to vector<8x256xbf16>
    %349 = vector.broadcast %5 : vector<1x256xbf16> to vector<8x256xbf16>
    %350 = arith.mulf %348, %349 : vector<8x256xbf16>
    %c5_185 = arith.constant 5 : index
    %c0_186 = arith.constant 0 : index
    %c0_187 = arith.constant 0 : index
    %351 = vector.load %arg5[%c5_185, %c0_186, %c0_187] : memref<9x8x8xbf16, #tpu.memory_space<vmem>>, vector<1x8x8xbf16>
    %352 = vector.shape_cast %351 : vector<1x8x8xbf16> to vector<8x8xbf16>
    %cst_188 = arith.constant dense<0.000000e+00> : vector<8x256xf32>
    %353 = tpu.matmul %352, %350, %cst_188 {dimension_numbers = #tpu.dot_dimension_numbers<[1], [0], [0], [1], [0, 0, 1, 1], [], []>} : vector<8x8xbf16>, vector<8x256xbf16>, vector<8x256xf32> -> vector<8x256xf32>
    %354 = arith.addf %346, %353 : vector<8x256xf32>
    %c241_i32_189 = arith.constant 241 : i32
    %355 = tpu.dynamic_rotate %310 by %c241_i32_189 dim 1 : vector<8x256xf32>, i32 -> vector<8x256xf32>
    %356 = arith.truncf %355 : vector<8x256xf32> to vector<8x256xbf16>
    %357 = vector.broadcast %6 : vector<1x256xbf16> to vector<8x256xbf16>
    %358 = arith.mulf %356, %357 : vector<8x256xbf16>
    %c6_190 = arith.constant 6 : index
    %c0_191 = arith.constant 0 : index
    %c0_192 = arith.constant 0 : index
    %359 = vector.load %arg5[%c6_190, %c0_191, %c0_192] : memref<9x8x8xbf16, #tpu.memory_space<vmem>>, vector<1x8x8xbf16>
    %360 = vector.shape_cast %359 : vector<1x8x8xbf16> to vector<8x8xbf16>
    %cst_193 = arith.constant dense<0.000000e+00> : vector<8x256xf32>
    %361 = tpu.matmul %360, %358, %cst_193 {dimension_numbers = #tpu.dot_dimension_numbers<[1], [0], [0], [1], [0, 0, 1, 1], [], []>} : vector<8x8xbf16>, vector<8x256xbf16>, vector<8x256xf32> -> vector<8x256xf32>
    %362 = arith.addf %354, %361 : vector<8x256xf32>
    %c240_i32_194 = arith.constant 240 : i32
    %363 = tpu.dynamic_rotate %310 by %c240_i32_194 dim 1 : vector<8x256xf32>, i32 -> vector<8x256xf32>
    %364 = arith.truncf %363 : vector<8x256xf32> to vector<8x256xbf16>
    %365 = vector.broadcast %7 : vector<1x256xbf16> to vector<8x256xbf16>
    %366 = arith.mulf %364, %365 : vector<8x256xbf16>
    %c7_195 = arith.constant 7 : index
    %c0_196 = arith.constant 0 : index
    %c0_197 = arith.constant 0 : index
    %367 = vector.load %arg5[%c7_195, %c0_196, %c0_197] : memref<9x8x8xbf16, #tpu.memory_space<vmem>>, vector<1x8x8xbf16>
    %368 = vector.shape_cast %367 : vector<1x8x8xbf16> to vector<8x8xbf16>
    %cst_198 = arith.constant dense<0.000000e+00> : vector<8x256xf32>
    %369 = tpu.matmul %368, %366, %cst_198 {dimension_numbers = #tpu.dot_dimension_numbers<[1], [0], [0], [1], [0, 0, 1, 1], [], []>} : vector<8x8xbf16>, vector<8x256xbf16>, vector<8x256xf32> -> vector<8x256xf32>
    %370 = arith.addf %362, %369 : vector<8x256xf32>
    %c239_i32_199 = arith.constant 239 : i32
    %371 = tpu.dynamic_rotate %310 by %c239_i32_199 dim 1 : vector<8x256xf32>, i32 -> vector<8x256xf32>
    %372 = arith.truncf %371 : vector<8x256xf32> to vector<8x256xbf16>
    %373 = vector.broadcast %8 : vector<1x256xbf16> to vector<8x256xbf16>
    %374 = arith.mulf %372, %373 : vector<8x256xbf16>
    %c8_200 = arith.constant 8 : index
    %c0_201 = arith.constant 0 : index
    %c0_202 = arith.constant 0 : index
    %375 = vector.load %arg5[%c8_200, %c0_201, %c0_202] : memref<9x8x8xbf16, #tpu.memory_space<vmem>>, vector<1x8x8xbf16>
    %376 = vector.shape_cast %375 : vector<1x8x8xbf16> to vector<8x8xbf16>
    %cst_203 = arith.constant dense<0.000000e+00> : vector<8x256xf32>
    %377 = tpu.matmul %376, %374, %cst_203 {dimension_numbers = #tpu.dot_dimension_numbers<[1], [0], [0], [1], [0, 0, 1, 1], [], []>} : vector<8x8xbf16>, vector<8x256xbf16>, vector<8x256xf32> -> vector<8x256xf32>
    %378 = arith.addf %370, %377 : vector<8x256xf32>
    %c1_204 = arith.constant 1 : index
    %c0_205 = arith.constant 0 : index
    %c0_206 = arith.constant 0 : index
    %379 = vector.load %arg1[%c1_204, %c0_205, %c0_206] : memref<2x8x256xf32, #tpu.memory_space<vmem>>, vector<1x8x256xf32>
    %380 = vector.shape_cast %379 : vector<1x8x256xf32> to vector<8x256xf32>
    %381 = arith.addf %378, %380 : vector<8x256xf32>
    %c1_207 = arith.constant 1 : index
    %c0_208 = arith.constant 0 : index
    %c0_209 = arith.constant 0 : index
    %382 = vector.load %arg9[%c1_207, %c0_208, %c0_209] : memref<2x8x256xf32, #tpu.memory_space<vmem>>, vector<1x8x256xf32>
    %383 = vector.shape_cast %382 : vector<1x8x256xf32> to vector<8x256xf32>
    %384 = vector.shape_cast %381 : vector<8x256xf32> to vector<1x8x256xf32>
    tpu.vector_store %arg9[%c1_207, %c0_208, %c0_209], %384 {strides = array<i32>} : memref<2x8x256xf32, #tpu.memory_space<vmem>>, vector<1x8x256xf32>,
    return
  }
  func.func @transform_0(%arg0: i32) -> (i32, i32, i32) {
    %c0_i32 = arith.constant 0 : i32
    %c0_i32_0 = arith.constant 0 : i32
    %c0_i32_1 = arith.constant 0 : i32
    return %arg0, %c0_i32, %c0_i32_0 : i32, i32, i32
  }
  func.func @transform_1(%arg0: i32) -> (i32, i32, i32) {
    %c0_i32 = arith.constant 0 : i32
    %c0_i32_0 = arith.constant 0 : i32
    %c0_i32_1 = arith.constant 0 : i32
    %c0_i32_2 = arith.constant 0 : i32
    return %c0_i32, %c0_i32_0, %c0_i32_1 : i32, i32, i32
  }
  func.func @transform_2(%arg0: i32) -> (i32, i32) {
    %c0_i32 = arith.constant 0 : i32
    %c0_i32_0 = arith.constant 0 : i32
    %c0_i32_1 = arith.constant 0 : i32
    return %c0_i32, %c0_i32_0 : i32, i32
  }
  func.func @transform_3(%arg0: i32) -> (i32, i32) {
    %c0_i32 = arith.constant 0 : i32
    %c0_i32_0 = arith.constant 0 : i32
    %c0_i32_1 = arith.constant 0 : i32
    return %c0_i32, %c0_i32_0 : i32, i32
  }
  func.func @transform_4(%arg0: i32) -> (i32, i32, i32) {
    %c0_i32 = arith.constant 0 : i32
    %c0_i32_0 = arith.constant 0 : i32
    %c0_i32_1 = arith.constant 0 : i32
    %c0_i32_2 = arith.constant 0 : i32
    return %c0_i32, %c0_i32_0, %c0_i32_1 : i32, i32, i32
  }
  func.func @transform_5(%arg0: i32) -> (i32, i32) {
    %c0_i32 = arith.constant 0 : i32
    %c0_i32_0 = arith.constant 0 : i32
    %c0_i32_1 = arith.constant 0 : i32
    return %c0_i32, %c0_i32_0 : i32, i32
  }
  func.func @transform_6(%arg0: i32) -> (i32, i32) {
    %c0_i32 = arith.constant 0 : i32
    %c0_i32_0 = arith.constant 0 : i32
    %c0_i32_1 = arith.constant 0 : i32
    return %c0_i32, %c0_i32_0 : i32, i32
  }
  func.func @transform_7(%arg0: i32) -> (i32, i32) {
    %c0_i32 = arith.constant 0 : i32
    %c0_i32_0 = arith.constant 0 : i32
    %c0_i32_1 = arith.constant 0 : i32
    return %c0_i32, %c0_i32_0 : i32, i32
  }
  func.func @transform_8(%arg0: i32) -> (i32, i32, i32) {
    %c0_i32 = arith.constant 0 : i32
    %c0_i32_0 = arith.constant 0 : i32
    %c0_i32_1 = arith.constant 0 : i32
    return %arg0, %c0_i32, %c0_i32_0 : i32, i32, i32
  }
}

</mosaic_0001>

<bundles_post_ra>
// kernel: tpu_custom_call.1
= control target key start
LH: loop header
LB: loop body
LE: loop exit
PB: predicated region body
PF: predicated region fallthrough
CT: control target
= control target key end

     0   :  { %13 = vsyncpa [#allocation3], 0  ;;  %s3650_s0 = inlined_call_operand.vmem [shape: f32[4,8,256], index: 0, kind: input, shape index: {}]   ;;  %s3651_s1 = inlined_call_operand.vmem [shape: bf16[9,8,8], index: 1, kind: input, shape index: {}]   ;;  %s3652_s2 = inlined_call_operand.vmem [shape: f32[8,1], index: 2, kind: input, shape index: {}]   ;;  %s3653_s3 = inlined_call_operand.vmem [shape: f32[8,1], index: 3, kind: input, shape index: {}]   ;;  %s3654_s4 = inlined_call_operand.vmem [shape: bf16[9,8,8], index: 4, kind: input, shape index: {}]   ;;  %s3655_s5 = inlined_call_operand.vmem [shape: f32[8,1], index: 5, kind: input, shape index: {}]   ;;  %s3656_s6 = inlined_call_operand.vmem [shape: f32[8,1], index: 6, kind: input, shape index: {}]   ;;  %s3657_s7 = inlined_call_operand.vmem [shape: bf16[9,256], index: 7, kind: input, shape index: {}]   ;;  %s3658_s8 = inlined_call_operand.hbm [shape: f32[4,8,256], index: 8, kind: output, shape index: {}]  }
   0x1   :  { %15 = vsyncpa [#allocation3 + $0x1], 0  ;;  %s2893_s27 = smov 0   ;;  %s2895_s28 = smov 0  }
   0x2   :  { %s2897_s29 = smov 0   ;;  %s2899_s30 = smov 0  }
   0x3 LB: > { %s2914_s9 = sadd.s32 4294967295, %s2836_s30   ;;  %s2424_s10 = sadd.s32 4294967294, %s2836_s30   ;;  %s2836_s30 = sphi %s2899_s30, %s3674_s30   ;;  %s2832_s29 = sphi %s2897_s29, %s3673_s29   ;;  %s2828_s28 = sphi %s2895_s28, %s3672_s28   ;;  %s2824_s27 = sphi %s2893_s27, %s3671_s27  }
   0x4   : > { %s2918_s11 = sadd.s32 1, %s2836_s30   ;;  %s201_s12 = sadd.s32 1, %s2832_s29 }
   0x5   : > { %s198_s13 = ssub.s32 %s2836_s30, %s2918_s11  ;;  %p211_p0 = scmp.ne.s32.totalorder %s2832_s29, %s2828_s28 }
   0x6   : > { %p199_p1 = scmp.eq.s32.totalorder %s198_s13, 0  ;;  %p212_p2 = scmp.eq.s32.totalorder %s2914_s9, 1 }
   0x7   : > { %p217_p3 = scmp.ne.s32.totalorder %s2828_s28, %s2824_s27  ;;  %p218_p4 = scmp.eq.s32.totalorder %s2424_s10, 1 }
   0x8   : > { %s2929_s14 = scalar_select %p199_p1, %s2832_s29, %s201_s12  }
   0x9   : > { %p2931_p5 = por %p212_p2, %p211_p0  ;;  %p2935_p6 = por %p218_p4, %p217_p3 }
   0xa   : > { %p2427_p7 = scmp.ge.s32.totalorder %s2836_s30, 1  ;;  %p267_p8 = scmp.lt.s32.totalorder %s2836_s30, 3 }
   0xc   : > { %p268_p9 = pnand %p2427_p7, %p267_p8 }
   0xd   : > { %s2429_s17 = sshll.u32 (!%p268_p9), %s2914_s9, 1  ;;  %s3664_s26 = smov (!%p268_p9), 1  }
   0xe   : > { %271 = sbr.rel (%p268_p9) target bundleno = 2262 (0x8d6), region = 52  ;;  %p303_p10 = scmp.lt.s32.totalorder (!%p268_p9), %s2429_s17, 3 }
   0xf   : > { %s2840_s10 = smov (!%p268_p9), 15   ;;  %s2841_s12 = smov (!%p268_p9), 16  }
  0x10   : > { %s3659_s13 = smov (!%p268_p9), 113   ;;  %s2845_s19 = smov (!%p268_p9), 127  }
  0x11   : > { %s3661_s20 = smov (!%p268_p9), 112   ;;  %s3667_s24 = smov (!%p268_p9), 112  }
  0x12   : > { %s3668_s25 = smov (!%p268_p9), 113   ;;  %s3669_s23 = smov (!%p268_p9), 1  }
  0x13   : > { %s3676_s17 = smov (!%p303_p10, %s2429_s17), 3  ;;  %v2838_v10 = vmov 0   ;;  %v2952_v19 = vld [vmem:[%s3652_s2] sm:$0xff]  ;;  %v363_v38 = vlaneseq  ;;  %vm421_vm5 = vcmask 1043456   ;;  %vm417_vm6 = vcmask 64512  }
  0x14   : > { %s2546_s18 = sshll.u32 %s3676_s17, 4  ;;  %2598 = vset.pattern.permute.xlu1 %v2838_v10  ;;  %2640 = vset.pattern.permute.xlu0 %v2838_v10  ;;  %v314_v23 = vld [vmem:[%s3653_s3] sm:$0xff]  ;;  %s2843_s17 = smov 17  }
  0x15   : > { %s2945_s21 = scalar_lea.vmem %s3650_s0, %s2546_s18  ;;  %2639 = vset.pattern.permute.xlu2 %v2838_v10  ;;  %s3663_s18 = smov 111   ;;  %v311_v33 = vld [vmem:[%s3657_s7] sm:$0xff]  ;;  %v2979_v41 = vand.u32 127, %v363_v38 }
  0x16   : > { %v317_v0 = vld [vmem:[%s2945_s21] sm:$0xff]  ;;  %v318_v1 = vld [vmem:[%s2945_s21 + $0x8] sm:$0xff]  ;;  %v370_v34 = vunpack.c.l.b16 %v311_v33  ;;  %v371_v35 = vunpack.c.h.b16 %v311_v33 }
  0x17   : > { %v319_v2 = vadd.f32 %v318_v1, %v317_v0  ;;  %vm395_vm3 = vcmp.lt.s32.totalorder %v2979_v41, 16  ;;  %vm365_vm4 = vcmp.lt.s32.totalorder %v2979_v41, 17  ;;  %vm648_vm7 = vcmp.lt.s32.totalorder %v2979_v41, 127 }
  0x18   : > { %v372_v36 = vpack.c.b16 %v370_v34, %v370_v34  ;;  %v373_v37 = vpack.c.b16 %v371_v35, %v371_v35  ;;  %vm550_vm8 = vcmp.lt.s32.totalorder %v2979_v41, 1  ;;  %vm493_vm9 = vcmp.lt.s32.totalorder %v2979_v41, 15 }
  0x19   : > { %320 = vadd.xlane.f32.xlu0 %v319_v2  ;;  %vm762_vm10 = vcmp.lt.s32.totalorder %v2979_v41, 112  ;;  %vm705_vm11 = vcmp.lt.s32.totalorder %v2979_v41, 113  ;;  %vm819_vm12 = vcmp.lt.s32.totalorder %v2979_v41, 111 }
  0x1a   : > { %v399_v39 = vshrl.u32 %v372_v36, 16  ;;  %v403_v40 = vshrl.u32 %v373_v37, 16  ;;  %v2992_v51 = vpack.i.b16 %v372_v36, %v372_v36  ;;  %v2998_v55 = vpack.i.b16 %v373_v37, %v373_v37 }
  0x1c   : > { %v2981_v42 = vpack.i.b16 %v399_v39, %v399_v39  ;;  %v2983_v43 = vpack.i.b16 %v403_v40, %v403_v40  ;;  %v377_v58 = vperm.slane %v2992_v51, 0  ;;  %v381_v62 = vperm.slane %v2998_v55, 0 }
  0x1d   : > { %v709_v37 = vperm.slane %v2992_v51, 3 }
  0x1e   : > { %v402_v45 = vperm.slane %v2981_v42, 0  ;;  %v406_v46 = vperm.slane %v2983_v43, 0  ;;  %v3015_v10 = vunpack.c.l.bf16 %v381_v62  ;;  %v767_v33 = vperm.slane %v2983_v43, 3 }
  0x20   : > { %v2994_v53 = vunpack.c.l.bf16 %v402_v45  ;;  %v2996_v54 = vunpack.c.l.bf16 %v406_v46 }
  0x8c   : > { %v321_v3 = vpop.xlane.xlu0 %320 }
  0x8d   : > { %v322_v4 = vmul.f32 0.00390625, %v321_v3 }
  0x8f   : > { %v323_v5 = vsub.f32 %v317_v0, %v322_v4  ;;  %v324_v6 = vsub.f32 %v318_v1, %v322_v4 }
  0x91   : > { %v325_v7 = vmul.f32 %v323_v5, %v323_v5  ;;  %v326_v8 = vmul.f32 %v324_v6, %v324_v6 }
  0x93   : > { %v327_v9 = vadd.f32 %v326_v8, %v325_v7 }
  0x95   : > { %328 = vadd.xlane.f32.xlu0 %v327_v9 }
 0x108   : > { %v329_v11 = vpop.xlane.xlu0 %328 }
 0x109   : > { %v330_v12 = vmul.f32 0.00390625, %v329_v11  ;;  %v2432_v11 = vld [vmem:[%s3651_s1 + $0x4] sm:$0xf] }
 0x10b   : > { %v331_v13 = vadd.f32 1e-05, %v330_v12 }
 0x10d   : > { %2761 = vrsqrt.f32 %v331_v13  ;;  %vm338_vm1 = vweird.f32 %v331_v13 }
 0x113   : > { %v2762_v14 = vpop.eup %2761 }
 0x114   : > { %v333_v15 = vmul.f32 %v2762_v14, %v331_v13  ;;  %vm339_vm0 = vweird.f32 %v2762_v14 }
 0x115   : > { %vm340_vm2 = vmor %vm338_vm1, %vm339_vm0 }
 0x116   : > { %v334_v16 = vmul.f32 %v2762_v14, %v333_v15 }
 0x118   : > { %v335_v17 = vmul.f32 0.5, %v334_v16  ;;  %v652_v16 = vperm.slane %v2981_v42, 2 }
 0x11a   : > { %v336_v18 = vsub.f32 1.5, %v335_v17  ;;  %v653_v17 = vperm.slane %v2983_v43, 2  ;;  %v3043_v36 = vunpack.c.l.bf16 %v652_v16 }
 0x11c   : > { %v337_v20 = vmul.f32 %v2762_v14, %v336_v18  ;;  %v3049_v40 = vunpack.c.l.bf16 %v653_v17 }
 0x11e   : > { %v341_v21 = vsel %vm340_vm2, %v2762_v14, %v337_v20 }
 0x11f   : > { %v342_v22 = vmul.f32 %v341_v21, %v2952_v19 }
 0x121   : > { %345 = vperm.xlu1 %2598, %v342_v22   ;;  %v497_v22 = vperm.slane %v2992_v51, 1 }
 0x123   : > { %v3058_v45 = vunpack.c.l.bf16 %v497_v22 }
 0x129   : > { %352 = vperm.xlu1 %2598, %v314_v23   ;;  %v498_v23 = vperm.slane %v2998_v55, 1 }
 0x12b   : > { %v3060_v46 = vunpack.c.l.bf16 %v498_v23 }
 0x193   : > { %v346_v24 = vpop.permute.xlu1 %345 }
 0x194   : > { %v348_v25 = vmul.f32 %v346_v24, %v323_v5  ;;  %v349_v26 = vmul.f32 %v346_v24, %v324_v6  ;;  %v3011_v6 = vunpack.c.l.bf16 %v377_v58 }
 0x19b   : > { %v2958_v27 = vpop.permute.xlu1 %352 }
 0x19c   : > { %v355_v28 = vadd.f32 %v2958_v27, %v348_v25  ;;  %v356_v29 = vadd.f32 %v2958_v27, %v349_v26  ;;  %v554_v26 = vperm.slane %v2981_v42, 1 }
 0x19e   : > { %v2962_v30 = vmax.f32 %v355_v28, 0.0  ;;  %v2964_v31 = vmax.f32 %v356_v29, 0.0  ;;  %v555_v28 = vperm.slane %v2983_v43, 1 }
 0x1a0   : > { %v2614_v32 = vpack.i.bf16 %v2964_v31, %v2962_v30  ;;  %v603_v3 = vpack.c.bf16 %v2962_v30, %v2962_v30  ;;  %v604_v15 = vpack.c.bf16 %v2964_v31, %v2964_v31 }
 0x1a2   : > { %2615 = vrot.lane.b32.xlu1 %v2614_v32, %s3664_s26  ;;  %2610 = vrot.lane.b32.xlu0 %v2614_v32, %s2840_s10  ;;  %v3021_v14 = vsel %vm421_vm5, %v603_v3, 0 }
 0x1a3   : > { %2600 = vrot.lane.b32.xlu2 %v2614_v32, %s2841_s12 }
 0x1aa   : > { %2625 = vrot.lane.b32.xlu1 %v2614_v32, %s3659_s13 }
 0x1ab   : > { %2605 = vrot.lane.b32.xlu2 %v2614_v32, %s2843_s17 }
 0x1b2   : > { %2635 = vrot.lane.b32.xlu1 %v2614_v32, %s3663_s18 }
 0x1b3   : > { %2620 = vrot.lane.b32.xlu2 %v2614_v32, %s2845_s19 }
 0x1bb   : > { %2630 = vrot.lane.b32.xlu2 %v2614_v32, %s3661_s20  ;;  %v766_v32 = vperm.slane %v2981_v42, 3  ;;  %v312_v42 = vld [vmem:[%s3657_s7 + $0x8] sm:$0x11] }
 0x1bc   : > { %v824_v58 = vunpack.c.l.b16 %v312_v42 }
 0x1fd   : > { %v2601_v44 = vpop.permute.xlu2 %2600 }
 0x1fe   : > { %v2603_v47 = vunpack.i.h.bf16 %v2601_v44  ;;  %v2602_v48 = vunpack.i.l.bf16 %v2601_v44  ;;  %v390_v44 = vld [vmem:[%s3651_s1] sm:$0xf] }
 0x200   : > { %v396_v49 = vsel %vm395_vm3, %v2602_v48, %v2603_v47  ;;  %v397_v50 = vsel %vm395_vm3, %v2603_v47, %v2602_v48  ;;  %v3062_v47 = vunpack.c.l.bf16 %v554_v26  ;;  %v3064_v48 = vunpack.c.l.bf16 %v555_v28 }
 0x201   : > { %v398_v52 = vpack.c.bf16 %v396_v49, %v397_v50  ;;  %v3066_v49 = vunpack.c.l.bf16 %v766_v32  ;;  %v3068_v50 = vunpack.c.l.bf16 %v767_v33 }
 0x203   : > { %v407_v56 = vunpack.c.l.bf16 %v398_v52  ;;  %v408_v57 = vunpack.c.h.bf16 %v398_v52 }
 0x205   : > { %v2606_v59 = vpop.permute.xlu2 %2605  ;;  %v411_v60 = vmul.f32 %v2994_v53, %v407_v56  ;;  %v412_v61 = vmul.f32 %v2996_v54, %v408_v57  ;;  %v3071_v56 = vunpack.c.l.bf16 %v709_v37  ;;  %v710_v57 = vperm.slane %v2998_v55, 3 }
 0x206   : > { %v2608_v63 = vunpack.i.h.bf16 %v2606_v59  ;;  %v2607_v0 = vunpack.i.l.bf16 %v2606_v59  ;;  %v825_v59 = vunpack.c.h.b16 %v312_v42 }
 0x207   : > { %v413_v1 = vpack.c.bf16 %v411_v60, %v411_v60  ;;  %v414_v2 = vpack.c.bf16 %v412_v61, %v412_v61  ;;  %v3088_v17 = vunpack.c.l.bf16 %v710_v57 }
 0x208   : > { %v366_v4 = vsel %vm365_vm4, %v2607_v0, %v2608_v63  ;;  %v367_v5 = vsel %vm365_vm4, %v2608_v63, %v2607_v0 }
 0x209   : > { %v423_v7 = vsel %vm421_vm5, %v413_v1, 0  ;;  %v426_v8 = vsel %vm421_vm5, %v414_v2, 0  ;;  %v368_v9 = vpack.c.bf16 %v366_v4, %v367_v5 }
 0x20a   : > { %435 = vmatpush.bf16.msra.mxu0 %v423_v7  ;;  %448 = vmatpush.bf16.msra.mxu1 %v426_v8 }
 0x20b   : > { %v382_v12 = vunpack.c.l.bf16 %v368_v9  ;;  %v383_v13 = vunpack.c.h.bf16 %v368_v9 }
 0x20d   : > { %v2621_v18 = vpop.permute.xlu2 %2620  ;;  %2433 = vmatmul.msk.bf16.vlgmr.msra.gmra.mxu0 %vm417_vm6, %v2432_v11  ;;  %2434 = vmatmul.msk.bf16.vlgmr.msra.gmra.mxu1 %vm417_vm6, %v2432_v11  ;;  %v386_v20 = vmul.f32 %v3011_v6, %v382_v12  ;;  %v387_v21 = vmul.f32 %v3015_v10, %v383_v13 }
 0x20e   : > { %v2623_v24 = vunpack.i.h.bf16 %v2621_v18  ;;  %v2622_v25 = vunpack.i.l.bf16 %v2621_v18  ;;  %v826_v18 = vpack.c.b16 %v824_v58, %v824_v58 }
 0x20f   : > { %v388_v29 = vpack.c.bf16 %v386_v20, %v386_v20  ;;  %v389_v30 = vpack.c.bf16 %v387_v21, %v387_v21  ;;  %v827_v20 = vpack.c.b16 %v825_v59, %v825_v59 }
 0x210   : > { %v649_v34 = vsel %vm648_vm7, %v2622_v25, %v2623_v24  ;;  %v650_v35 = vsel %vm648_vm7, %v2623_v24, %v2622_v25 }
 0x211   : > { %v458_v38 = vsel %vm421_vm5, %v388_v29, 0  ;;  %v461_v39 = vsel %vm421_vm5, %v389_v30, 0  ;;  %v651_v43 = vpack.c.bf16 %v650_v35, %v649_v34 }
 0x212   : > { %470 = vmatpush.bf16.msra.mxu2 %v458_v38  ;;  %483 = vmatpush.bf16.msra.mxu3 %v461_v39 }
 0x213   : > { %v654_v3 = vunpack.c.l.bf16 %v651_v43  ;;  %v655_v4 = vunpack.c.h.bf16 %v651_v43 }
 0x214   : > { %v2616_v51 = vpop.permute.xlu1 %2615  ;;  %v2611_v52 = vpop.permute.xlu0 %2610 }
 0x215   : > { %v2618_v60 = vunpack.i.h.bf16 %v2616_v51  ;;  %v2617_v61 = vunpack.i.l.bf16 %v2616_v51  ;;  %v2613_v62 = vunpack.i.h.bf16 %v2611_v52  ;;  %v2612_v63 = vunpack.i.l.bf16 %v2611_v52  ;;  %v2631_v0 = vpop.permute.xlu2 %2630  ;;  %2435 = vmatmul.msk.bf16.vlgmr.msra.gmra.mxu2 %vm417_vm6, %v390_v44  ;;  %2436 = vmatmul.msk.bf16.vlgmr.msra.gmra.mxu3 %vm417_vm6, %v390_v44 }
 0x216   : > { %v2633_v1 = vunpack.i.h.bf16 %v2631_v0  ;;  %v2632_v2 = vunpack.i.l.bf16 %v2631_v0  ;;  %v658_v25 = vmul.f32 %v3043_v36, %v654_v3  ;;  %v659_v26 = vmul.f32 %v3049_v40, %v655_v4 }
 0x217   : > { %v551_v5 = vsel %vm550_vm8, %v2617_v61, %v2618_v60  ;;  %v552_v55 = vsel %vm550_vm8, %v2618_v60, %v2617_v61  ;;  %v494_v7 = vsel %vm493_vm9, %v2612_v63, %v2613_v62  ;;  %v495_v8 = vsel %vm493_vm9, %v2613_v62, %v2612_v63 }
 0x218   : > { %v763_v9 = vsel %vm762_vm10, %v2632_v2, %v2633_v1  ;;  %v764_v11 = vsel %vm762_vm10, %v2633_v1, %v2632_v2  ;;  %v496_v12 = vpack.c.bf16 %v494_v7, %v495_v8  ;;  %v553_v13 = vpack.c.bf16 %v551_v5, %v552_v55  ;;  %v2437_v5 = vld [vmem:[%s3651_s1 + $0x8] sm:$0xf] }
 0x219   : > { %v765_v16 = vpack.c.bf16 %v764_v11, %v763_v9  ;;  %v660_v59 = vpack.c.bf16 %v658_v25, %v658_v25  ;;  %v661_v60 = vpack.c.bf16 %v659_v26, %v659_v26  ;;  %v614_v2 = vsel %vm421_vm5, %v604_v15, 0  ;;  %v2440_v15 = vld [vmem:[%s3651_s1 + $0xc] sm:$0xf] }
 0x21a   : > { %v499_v21 = vunpack.c.l.bf16 %v496_v12  ;;  %v500_v22 = vunpack.c.h.bf16 %v496_v12  ;;  %v556_v23 = vunpack.c.l.bf16 %v553_v13  ;;  %v557_v24 = vunpack.c.h.bf16 %v553_v13 }
 0x21b   : > { %v768_v28 = vunpack.c.l.bf16 %v765_v16  ;;  %v769_v29 = vunpack.c.h.bf16 %v765_v16  ;;  %v829_v3 = vpack.i.b16 %v826_v18, %v826_v18  ;;  %v833_v4 = vpack.i.b16 %v827_v20, %v827_v20 }
 0x21c   : > { %v2626_v30 = vpop.permute.xlu1 %2625  ;;  %v503_v32 = vmul.f32 %v3058_v45, %v499_v21  ;;  %v504_v33 = vmul.f32 %v3060_v46, %v500_v22  ;;  %v560_v34 = vmul.f32 %v3062_v47, %v556_v23  ;;  %v561_v35 = vmul.f32 %v3064_v48, %v557_v24 }
 0x21d   : > { %v2628_v37 = vunpack.i.h.bf16 %v2626_v30  ;;  %v2627_v38 = vunpack.i.l.bf16 %v2626_v30  ;;  %v772_v39 = vmul.f32 %v3066_v49, %v768_v28  ;;  %v773_v42 = vmul.f32 %v3068_v50, %v769_v29 }
 0x21e   : > { %v505_v43 = vpack.c.bf16 %v503_v32, %v503_v32  ;;  %v506_v44 = vpack.c.bf16 %v504_v33, %v504_v33  ;;  %v562_v51 = vpack.c.bf16 %v560_v34, %v560_v34  ;;  %v563_v52 = vpack.c.bf16 %v561_v35, %v561_v35 }
 0x21f   : > { %v706_v57 = vsel %vm705_vm11, %v2627_v38, %v2628_v37  ;;  %v707_v58 = vsel %vm705_vm11, %v2628_v37, %v2627_v38  ;;  %v774_v55 = vpack.c.bf16 %v772_v39, %v772_v39  ;;  %v775_v7 = vpack.c.bf16 %v773_v42, %v773_v42  ;;  %v2443_v42 = vld [vmem:[%s3651_s1 + $0x10] sm:$0xf] }
 0x220   : > { %v708_v61 = vpack.c.bf16 %v707_v58, %v706_v57  ;;  %v513_v62 = vsel %vm421_vm5, %v505_v43, 0  ;;  %v516_v63 = vsel %vm421_vm5, %v506_v44, 0  ;;  %v570_v0 = vsel %vm421_vm5, %v562_v51, 0  ;;  %v2446_v51 = vld [vmem:[%s3651_s1 + $0x14] sm:$0xf] }
 0x221   : > { %525 = vmatpush.bf16.msrb.mxu0 %v513_v62  ;;  %538 = vmatpush.bf16.msrb.mxu1 %v516_v63  ;;  %v573_v1 = vsel %vm421_vm5, %v563_v52, 0  ;;  %v668_v11 = vsel %vm421_vm5, %v660_v59, 0  ;;  %v671_v31 = vsel %vm421_vm5, %v661_v60, 0  ;;  %v831_v20 = vperm.slane %v829_v3, 0  ;;  %v2449_v58 = vld [vmem:[%s3651_s1 + $0x18] sm:$0xf] }
 0x222   : > { %582 = vmatpush.bf16.msrb.mxu2 %v570_v0  ;;  %595 = vmatpush.bf16.msrb.mxu3 %v573_v1  ;;  %v711_v8 = vunpack.c.l.bf16 %v708_v61  ;;  %v712_v9 = vunpack.c.h.bf16 %v708_v61  ;;  %v835_v21 = vperm.slane %v833_v4, 0  ;;  %v782_v22 = vsel %vm421_vm5, %v774_v55, 0  ;;  %v2452_v59 = vld [vmem:[%s3651_s1 + $0x1c] sm:$0xf]  ;;  %v2455_v60 = vld [vmem:[%s3651_s1 + $0x20] sm:$0xf] }
 0x223   : > { %v785_v23 = vsel %vm421_vm5, %v775_v7, 0  ;;  %v3134_v34 = vunpack.c.l.bf16 %v831_v20 }
 0x224   : > { %v2636_v12 = vpop.permute.xlu1 %2635  ;;  %v715_v13 = vmul.f32 %v3071_v56, %v711_v8  ;;  %v716_v16 = vmul.f32 %v3088_v17, %v712_v9  ;;  %2438 = vmatmul.msk.bf16.vlgmr.msrb.gmra.mxu0 %vm417_vm6, %v2437_v5  ;;  %2439 = vmatmul.msk.bf16.vlgmr.msrb.gmra.mxu1 %vm417_vm6, %v2437_v5  ;;  %v3136_v37 = vunpack.c.l.bf16 %v835_v21  ;;  %v2484_v21 = vld [vmem:[%s2945_s21 + $0x10] sm:$0xff] }
 0x225   : > { %623 = vmatpush.bf16.msra.mxu0 %v3021_v14  ;;  %636 = vmatpush.bf16.msra.mxu1 %v614_v2  ;;  %v2638_v18 = vunpack.i.h.bf16 %v2636_v12  ;;  %v2637_v14 = vunpack.i.l.bf16 %v2636_v12 }
 0x226   : > { %680 = vmatpush.bf16.msra.mxu2 %v668_v11  ;;  %693 = vmatpush.bf16.msra.mxu3 %v671_v31  ;;  %v717_v24 = vpack.c.bf16 %v715_v13, %v715_v13  ;;  %v718_v25 = vpack.c.bf16 %v716_v16, %v716_v16 }
 0x227   : > { %2441 = vmatmul.msk.bf16.vlgmr.msrb.gmra.mxu2 %vm417_vm6, %v2440_v15  ;;  %2442 = vmatmul.msk.bf16.vlgmr.msrb.gmra.mxu3 %vm417_vm6, %v2440_v15  ;;  %v820_v26 = vsel %vm819_vm12, %v2637_v14, %v2638_v18  ;;  %v821_v28 = vsel %vm819_vm12, %v2638_v18, %v2637_v14 }
 0x228   : > { %v822_v29 = vpack.c.bf16 %v821_v28, %v820_v26  ;;  %v725_v30 = vsel %vm421_vm5, %v717_v24, 0  ;;  %v728_v32 = vsel %vm421_vm5, %v718_v25, 0 }
 0x229   : > { %737 = vmatpush.bf16.msrb.mxu0 %v725_v30  ;;  %750 = vmatpush.bf16.msrb.mxu1 %v728_v32 }
 0x22a   : > { %794 = vmatpush.bf16.msrb.mxu2 %v782_v22  ;;  %807 = vmatpush.bf16.msrb.mxu3 %v785_v23  ;;  %v836_v33 = vunpack.c.l.bf16 %v822_v29  ;;  %v837_v35 = vunpack.c.h.bf16 %v822_v29  ;;  %v2485_v22 = vld [vmem:[%s2945_s21 + $0x18] sm:$0xff] }
 0x22b   : > { %v1382_v23 = vadd.f32 %v2485_v22, %v2484_v21 }
 0x22c   : > { %v840_v38 = vmul.f32 %v3134_v34, %v836_v33  ;;  %v841_v39 = vmul.f32 %v3136_v37, %v837_v35 }
 0x22d   : > { %1383 = vadd.xlane.f32.xlu1 %v1382_v23 }
 0x22e   : > { %v842_v43 = vpack.c.bf16 %v840_v38, %v840_v38  ;;  %v843_v44 = vpack.c.bf16 %v841_v39, %v841_v39 }
 0x230   : > { %v850_v52 = vsel %vm421_vm5, %v842_v43, 0  ;;  %v853_v57 = vsel %vm421_vm5, %v843_v44, 0 }
 0x234   : > { %2444 = vmatmul.msk.bf16.vlgmr.msra.gmra.mxu0 %vm417_vm6, %v2443_v42  ;;  %2445 = vmatmul.msk.bf16.vlgmr.msra.gmra.mxu1 %vm417_vm6, %v2443_v42 }
 0x235   : > { %862 = vmatpush.bf16.msra.mxu0 %v850_v52  ;;  %875 = vmatpush.bf16.msra.mxu1 %v853_v57 }
 0x237   : > { %2447 = vmatmul.msk.bf16.vlgmr.msra.gmra.mxu2 %vm417_vm6, %v2446_v51  ;;  %2448 = vmatmul.msk.bf16.vlgmr.msra.gmra.mxu3 %vm417_vm6, %v2446_v51 }
 0x244   : > { %2450 = vmatmul.msk.bf16.vlgmr.msrb.gmra.mxu0 %vm417_vm6, %v2449_v58  ;;  %2451 = vmatmul.msk.bf16.vlgmr.msrb.gmra.mxu1 %vm417_vm6, %v2449_v58 }
 0x247   : > { %2453 = vmatmul.msk.bf16.vlgmr.msrb.gmra.mxu2 %vm417_vm6, %v2452_v59  ;;  %2454 = vmatmul.msk.bf16.vlgmr.msrb.gmra.mxu3 %vm417_vm6, %v2452_v59 }
 0x254   : > { %2456 = vmatmul.msk.bf16.vlgmr.msra.gmra.mxu0 %vm417_vm6, %v2455_v60  ;;  %2457 = vmatmul.msk.bf16.vlgmr.msra.gmra.mxu1 %vm417_vm6, %v2455_v60 }
 0x28a   : > { %v437_v61 = vpop.f32.mrf.mxu0  ;;  %v450_v62 = vpop.f32.mrf.mxu1 }
 0x292   : > { %v439_v63 = vpop.f32.mrf.mxu0  ;;  %v452_v0 = vpop.f32.mrf.mxu1 }
 0x298   : > { %v472_v1 = vpop.f32.mrf.mxu2  ;;  %v485_v2 = vpop.f32.mrf.mxu3 }
 0x299   : > { %v473_v29 = vadd.f32 %v472_v1, %v437_v61  ;;  %v486_v30 = vadd.f32 %v485_v2, %v450_v62 }
 0x2a0   : > { %v474_v3 = vpop.f32.mrf.mxu2  ;;  %v487_v4 = vpop.f32.mrf.mxu3 }
 0x2a1   : > { %v527_v5 = vpop.f32.mrf.mxu0  ;;  %v540_v55 = vpop.f32.mrf.mxu1 }
 0x2a2   : > { %v544_v32 = vadd.f32 %v527_v5, %v473_v29  ;;  %v545_v33 = vadd.f32 %v540_v55, %v486_v30 }
 0x2a9   : > { %v529_v9 = vpop.f32.mrf.mxu0  ;;  %v542_v11 = vpop.f32.mrf.mxu1 }
 0x2aa   : > { %v584_v7 = vpop.f32.mrf.mxu2  ;;  %v597_v8 = vpop.f32.mrf.mxu3 }
 0x2ab   : > { %v601_v35 = vadd.f32 %v584_v7, %v544_v32  ;;  %v602_v38 = vadd.f32 %v597_v8, %v545_v33  ;;  %v1384_v8 = vpop.xlane.xlu1 %1383 }
 0x2ac   : > { %v1385_v9 = vmul.f32 0.00390625, %v1384_v8 }
 0x2ae   : > { %v3169_v11 = vsub.f32 %v2484_v21, %v1385_v9  ;;  %v316_v21 = vld [vmem:[%s3656_s6] sm:$0xff] }
 0x2b1   : > { %v625_v12 = vpop.f32.mrf.mxu0  ;;  %v638_v13 = vpop.f32.mrf.mxu1 }
 0x2b2   : > { %v586_v31 = vpop.f32.mrf.mxu2  ;;  %v599_v15 = vpop.f32.mrf.mxu3  ;;  %v642_v51 = vadd.f32 %v625_v12, %v601_v35  ;;  %v643_v52 = vadd.f32 %v638_v13, %v602_v38  ;;  %v315_v38 = vld [vmem:[%s3655_s5] sm:$0xff] }
 0x2b3   : > { %v3171_v31 = vsub.f32 %v2485_v22, %v1385_v9  ;;  %v1388_v15 = vmul.f32 %v3169_v11, %v3169_v11 }
 0x2b5   : > { %v1389_v12 = vmul.f32 %v3171_v31, %v3171_v31 }
 0x2b7   : > { %v1390_v13 = vadd.f32 %v1389_v12, %v1388_v15 }
 0x2b9   : > { %v627_v14 = vpop.f32.mrf.mxu0  ;;  %v640_v20 = vpop.f32.mrf.mxu1  ;;  %1391 = vadd.xlane.f32.xlu1 %v1390_v13 }
 0x2ba   : > { %v682_v16 = vpop.f32.mrf.mxu2  ;;  %v695_v18 = vpop.f32.mrf.mxu3 }
 0x2bb   : > { %v699_v57 = vadd.f32 %v682_v16, %v642_v51  ;;  %v700_v58 = vadd.f32 %v695_v18, %v643_v52 }
 0x2c1   : > { %v739_v26 = vpop.f32.mrf.mxu0  ;;  %v752_v28 = vpop.f32.mrf.mxu1 }
 0x2c2   : > { %v684_v24 = vpop.f32.mrf.mxu2  ;;  %v697_v25 = vpop.f32.mrf.mxu3  ;;  %v756_v59 = vadd.f32 %v739_v26, %v699_v57  ;;  %v757_v60 = vadd.f32 %v752_v28, %v700_v58 }
 0x2c9   : > { %v741_v43 = vpop.f32.mrf.mxu0  ;;  %v754_v44 = vpop.f32.mrf.mxu1 }
 0x2ca   : > { %v796_v39 = vpop.f32.mrf.mxu2  ;;  %v809_v42 = vpop.f32.mrf.mxu3 }
 0x2cb   : > { %v813_v63 = vadd.f32 %v796_v39, %v756_v59  ;;  %v814_v0 = vadd.f32 %v809_v42, %v757_v60 }
 0x2d1   : > { %v864_v61 = vpop.f32.mrf.mxu0  ;;  %v877_v62 = vpop.f32.mrf.mxu1 }
 0x2d2   : > { %v798_v3 = vpop.f32.mrf.mxu2  ;;  %v811_v4 = vpop.f32.mrf.mxu3  ;;  %v881_v1 = vadd.f32 %v864_v61, %v813_v63  ;;  %v882_v2 = vadd.f32 %v877_v62, %v814_v0 }
 0x2d4   : > { %v883_v5 = vadd.f32 %v882_v2, %v881_v1 }
 0x2d6   : > { %884 = vadd.xlane.f32.xlu2 %v883_v5 }
 0x2d9   : > { %v866_v55 = vpop.f32.mrf.mxu0  ;;  %v879_v7 = vpop.f32.mrf.mxu1 }
 0x32c   : > { %v1392_v44 = vpop.xlane.xlu1 %1391 }
 0x32d   : > { %v1393_v51 = vmul.f32 0.00390625, %v1392_v44 }
 0x32f   : > { %v1394_v52 = vadd.f32 1e-05, %v1393_v51 }
 0x331   : > { %vm1401_vm0 = vweird.f32 %v1394_v52 }
 0x349   : > { %v885_v16 = vpop.xlane.xlu2 %884 }
 0x34a   : > { %v886_v18 = vmul.f32 0.00390625, %v885_v16 }
 0x34c   : > { %v887_v14 = vsub.f32 %v881_v1, %v886_v18  ;;  %v888_v20 = vsub.f32 %v882_v2, %v886_v18 }
 0x34e   : > { %v889_v23 = vmul.f32 %v887_v14, %v887_v14  ;;  %v890_v24 = vmul.f32 %v888_v20, %v888_v20 }
 0x350   : > { %v891_v25 = vadd.f32 %v890_v24, %v889_v23 }
 0x352   : > { %892 = vadd.xlane.f32.xlu0 %v891_v25 }
 0x366   : > { %916 = vperm.xlu0 %2640, %v316_v21  }
 0x3c5   : > { %v893_v22 = vpop.xlane.xlu0 %892 }
 0x3c6   : > { %v894_v26 = vmul.f32 0.00390625, %v893_v22 }
 0x3c8   : > { %v895_v28 = vadd.f32 1e-05, %v894_v26 }
 0x3ca   : > { %2763 = vrsqrt.f32 %v895_v28  ;;  %vm902_vm14 = vweird.f32 %v895_v28 }
 0x3cb   : > { %2765 = vrsqrt.f32 %v1394_v52 }
 0x3d0   : > { %v2764_v29 = vpop.eup %2763 }
 0x3d1   : > { %v897_v30 = vmul.f32 %v2764_v29, %v895_v28  ;;  %vm903_vm13 = vweird.f32 %v2764_v29  ;;  %v2766_v57 = vpop.eup %2765 }
 0x3d2   : > { %vm904_vm15 = vmor %vm902_vm14, %vm903_vm13  ;;  %v1396_v58 = vmul.f32 %v2766_v57, %v1394_v52  ;;  %vm1402_vm1 = vweird.f32 %v2766_v57 }
 0x3d3   : > { %v898_v32 = vmul.f32 %v2764_v29, %v897_v30  ;;  %vm1403_vm2 = vmor %vm1401_vm0, %vm1402_vm1 }
 0x3d4   : > { %v1397_v59 = vmul.f32 %v2766_v57, %v1396_v58 }
 0x3d5   : > { %v899_v33 = vmul.f32 0.5, %v898_v32 }
 0x3d6   : > { %v1398_v0 = vmul.f32 0.5, %v1397_v59 }
 0x3d7   : > { %v900_v35 = vsub.f32 1.5, %v899_v33 }
 0x3d8   : > { %v3183_v63 = vpop.permute.xlu0 %916  ;;  %v1399_v1 = vsub.f32 1.5, %v1398_v0 }
 0x3d9   : > { %v901_v39 = vmul.f32 %v2764_v29, %v900_v35 }
 0x3da   : > { %v1400_v7 = vmul.f32 %v2766_v57, %v1399_v1 }
 0x3db   : > { %v905_v42 = vsel %vm904_vm15, %v2764_v29, %v901_v39  ;;  %v936_v29 = vld [vmem:[%s3654_s4] sm:$0xf] }
 0x3dc   : > { %v906_v43 = vmul.f32 %v905_v42, %v315_v38  ;;  %v1404_v8 = vsel %vm1403_vm2, %v2766_v57, %v1400_v7 }
 0x3dd   : > { %v1405_v9 = vmul.f32 %v1404_v8, %v2952_v19 }
 0x3de   : > { %909 = vperm.xlu2 %2639, %v906_v43  }
 0x438   : > { %v910_v60 = vpop.permute.xlu2 %909 }
 0x439   : > { %v912_v3 = vmul.f32 %v910_v60, %v887_v14  ;;  %v913_v4 = vmul.f32 %v910_v60, %v888_v20 }
 0x43b   : > { %v919_v61 = vadd.f32 %v3183_v63, %v912_v3  ;;  %v920_v62 = vadd.f32 %v3183_v63, %v913_v4 }
 0x43d   : > { %v3187_v2 = vmax.f32 %v919_v61, 0.0  ;;  %v3189_v5 = vmax.f32 %v920_v62, 0.0 }
 0x43f   : > { %v2661_v55 = vpack.i.bf16 %v3189_v5, %v3187_v2 }
 0x441   : > { %2662 = vrot.lane.b32.xlu0 %v2661_v55, %s2845_s19  ;;  %2647 = vrot.lane.b32.xlu2 %v2661_v55, %s2843_s17 }
 0x442   : > { %2642 = vrot.lane.b32.xlu1 %v2661_v55, %s2841_s12 }
 0x449   : > { %2677 = vrot.lane.b32.xlu0 %v2661_v55, %s3663_s18  ;;  %2652 = vrot.lane.b32.xlu2 %v2661_v55, %s2840_s10 }
 0x44a   : > { %1408 = vperm.xlu1 %2598, %v1405_v9  }
 0x451   : > { %2657 = vrot.lane.b32.xlu2 %v2661_v55, %s3664_s26 }
 0x452   : > { %2672 = vrot.lane.b32.xlu1 %v2661_v55, %s3667_s24 }
 0x459   : > { %2667 = vrot.lane.b32.xlu2 %v2661_v55, %s3668_s25 }
 0x49b   : > { %v2648_v15 = vpop.permute.xlu2 %2647 }
 0x49c   : > { %v2650_v12 = vunpack.i.h.bf16 %v2648_v15  ;;  %v2649_v13 = vunpack.i.l.bf16 %v2648_v15 }
 0x49e   : > { %v927_v16 = vsel %vm365_vm4, %v2649_v13, %v2650_v12  ;;  %v928_v19 = vsel %vm365_vm4, %v2650_v12, %v2649_v13 }
 0x49f   : > { %v929_v18 = vpack.c.bf16 %v927_v16, %v928_v19 }
 0x4a1   : > { %v930_v14 = vunpack.c.l.bf16 %v929_v18  ;;  %v931_v20 = vunpack.c.h.bf16 %v929_v18 }
 0x4a3   : > { %v2653_v23 = vpop.permute.xlu2 %2652  ;;  %v932_v24 = vmul.f32 %v930_v14, %v3011_v6  ;;  %v933_v25 = vmul.f32 %v931_v20, %v3015_v10 }
 0x4a4   : > { %v2655_v30 = vunpack.i.h.bf16 %v2653_v23  ;;  %v2654_v32 = vunpack.i.l.bf16 %v2653_v23 }
 0x4a5   : > { %v934_v21 = vpack.c.bf16 %v932_v24, %v932_v24  ;;  %v935_v22 = vpack.c.bf16 %v933_v25, %v933_v25 }
 0x4a6   : > { %v1026_v39 = vsel %vm493_vm9, %v2654_v32, %v2655_v30  ;;  %v1027_v42 = vsel %vm493_vm9, %v2655_v30, %v2654_v32 }
 0x4a7   : > { %v991_v26 = vsel %vm421_vm5, %v934_v21, 0  ;;  %v994_v28 = vsel %vm421_vm5, %v935_v22, 0  ;;  %v1028_v52 = vpack.c.bf16 %v1026_v39, %v1027_v42 }
 0x4a8   : > { %1003 = vmatpush.bf16.msrb.mxu0 %v991_v26  ;;  %1016 = vmatpush.bf16.msrb.mxu1 %v994_v28  ;;  %v2466_v26 = vld [vmem:[%s3654_s4 + $0xc] sm:$0xf] }
 0x4a9   : > { %v1029_v62 = vunpack.c.l.bf16 %v1028_v52  ;;  %v1030_v1 = vunpack.c.h.bf16 %v1028_v52 }
 0x4ab   : > { %v2658_v33 = vpop.permute.xlu2 %2657  ;;  %2461 = vmatmul.msk.bf16.vlgmr.msrb.gmra.mxu0 %vm417_vm6, %v936_v29  ;;  %2462 = vmatmul.msk.bf16.vlgmr.msrb.gmra.mxu1 %vm417_vm6, %v936_v29  ;;  %v1031_v24 = vmul.f32 %v1029_v62, %v3058_v45  ;;  %v1032_v22 = vmul.f32 %v1030_v1, %v3060_v46 }
 0x4ac   : > { %v2660_v35 = vunpack.i.h.bf16 %v2658_v33  ;;  %v2659_v38 = vunpack.i.l.bf16 %v2658_v33 }
 0x4ae   : > { %v1078_v43 = vsel %vm550_vm8, %v2659_v38, %v2660_v35  ;;  %v1079_v44 = vsel %vm550_vm8, %v2660_v35, %v2659_v38 }
 0x4af   : > { %v1080_v51 = vpack.c.bf16 %v1078_v43, %v1079_v44  ;;  %v1033_v43 = vpack.c.bf16 %v1031_v24, %v1031_v24 }
 0x4b1   : > { %v1081_v57 = vunpack.c.l.bf16 %v1080_v51  ;;  %v1082_v58 = vunpack.c.h.bf16 %v1080_v51 }
 0x4b3   : > { %v2663_v59 = vpop.permute.xlu0 %2662  ;;  %v1083_v60 = vmul.f32 %v1081_v57, %v3062_v47  ;;  %v1084_v0 = vmul.f32 %v1082_v58, %v3064_v48  ;;  %v2668_v16 = vpop.permute.xlu2 %2667 }
 0x4b4   : > { %v2665_v3 = vunpack.i.h.bf16 %v2663_v59  ;;  %v2664_v4 = vunpack.i.l.bf16 %v2663_v59  ;;  %v2643_v61 = vpop.permute.xlu1 %2642  ;;  %v2670_v28 = vunpack.i.h.bf16 %v2668_v16  ;;  %v2669_v29 = vunpack.i.l.bf16 %v2668_v16 }
 0x4b5   : > { %v2645_v55 = vunpack.i.h.bf16 %v2643_v61  ;;  %v2644_v7 = vunpack.i.l.bf16 %v2643_v61  ;;  %v1085_v8 = vpack.c.bf16 %v1083_v60, %v1083_v60  ;;  %v1086_v9 = vpack.c.bf16 %v1084_v0, %v1084_v0 }
 0x4b6   : > { %v1171_v15 = vsel %vm648_vm7, %v2664_v4, %v2665_v3  ;;  %v1172_v12 = vsel %vm648_vm7, %v2665_v3, %v2664_v4  ;;  %v1223_v58 = vsel %vm705_vm11, %v2669_v29, %v2670_v28  ;;  %v1034_v0 = vpack.c.bf16 %v1032_v22, %v1032_v22 }
 0x4b7   : > { %v1173_v13 = vpack.c.bf16 %v1172_v12, %v1171_v15  ;;  %v941_v19 = vsel %vm395_vm3, %v2644_v7, %v2645_v55  ;;  %v942_v18 = vsel %vm395_vm3, %v2645_v55, %v2644_v7  ;;  %v1093_v20 = vsel %vm421_vm5, %v1085_v8, 0 }
 0x4b8   : > { %v943_v14 = vpack.c.bf16 %v941_v19, %v942_v18  ;;  %v1096_v23 = vsel %vm421_vm5, %v1086_v9, 0  ;;  %1105 = vmatpush.bf16.msra.mxu0 %v1093_v20  ;;  %v1224_v3 = vsel %vm705_vm11, %v2670_v28, %v2669_v29  ;;  %v1041_v8 = vsel %vm421_vm5, %v1033_v43, 0 }
 0x4b9   : > { %1118 = vmatpush.bf16.msra.mxu1 %v1096_v23  ;;  %v1174_v25 = vunpack.c.l.bf16 %v1173_v13  ;;  %v1175_v21 = vunpack.c.h.bf16 %v1173_v13  ;;  %v1126_v9 = vpack.c.bf16 %v3187_v2, %v3187_v2  ;;  %v1225_v15 = vpack.c.bf16 %v1224_v3, %v1223_v58 }
 0x4ba   : > { %v944_v30 = vunpack.c.l.bf16 %v943_v14  ;;  %v945_v32 = vunpack.c.h.bf16 %v943_v14  ;;  %v1044_v12 = vsel %vm421_vm5, %v1034_v0, 0  ;;  %v1127_v13 = vpack.c.bf16 %v3189_v5, %v3189_v5 }
 0x4bb   : > { %v1176_v33 = vmul.f32 %v1174_v25, %v3043_v36  ;;  %v1177_v35 = vmul.f32 %v1175_v21, %v3049_v40  ;;  %2467 = vmatmul.msk.bf16.vlgmr.msra.gmra.mxu0 %vm417_vm6, %v2466_v26  ;;  %v1134_v2 = vsel %vm421_vm5, %v1126_v9, 0  ;;  %v1226_v20 = vunpack.c.l.bf16 %v1225_v15  ;;  %v2678_v25 = vpop.permute.xlu0 %2677 }
 0x4bc   : > { %v1409_v38 = vpop.permute.xlu1 %1408  ;;  %v946_v39 = vmul.f32 %v944_v30, %v2994_v53  ;;  %v947_v42 = vmul.f32 %v945_v32, %v2996_v54  ;;  %2468 = vmatmul.msk.bf16.vlgmr.msra.gmra.mxu1 %vm417_vm6, %v2466_v26  ;;  %v1137_v5 = vsel %vm421_vm5, %v1127_v13, 0  ;;  %v1227_v22 = vunpack.c.h.bf16 %v1225_v15  ;;  %v2475_v13 = vld [vmem:[%s3654_s4 + $0x18] sm:$0xf] }
 0x4bd   : > { %v1411_v44 = vmul.f32 %v1409_v38, %v3169_v11  ;;  %v1412_v51 = vmul.f32 %v1409_v38, %v3171_v31  ;;  %v1178_v52 = vpack.c.bf16 %v1176_v33, %v1176_v33  ;;  %v1179_v57 = vpack.c.bf16 %v1177_v35, %v1177_v35 }
 0x4be   : > { %v948_v59 = vpack.c.bf16 %v946_v39, %v946_v39  ;;  %v949_v60 = vpack.c.bf16 %v947_v42, %v947_v42  ;;  %v1228_v29 = vmul.f32 %v1226_v20, %v3071_v56  ;;  %v2680_v30 = vunpack.i.h.bf16 %v2678_v25 }
 0x4bf   : > { %v1413_v4 = vadd.f32 %v1411_v44, %v2958_v27  ;;  %v1414_v61 = vadd.f32 %v1412_v51, %v2958_v27  ;;  %v1186_v62 = vsel %vm421_vm5, %v1178_v52, 0  ;;  %v1189_v1 = vsel %vm421_vm5, %v1179_v57, 0  ;;  %v2458_v27 = vld [vmem:[%s3654_s4 + $0x4] sm:$0xf] }
 0x4c0   : > { %v956_v11 = vsel %vm421_vm5, %v948_v59, 0  ;;  %v959_v31 = vsel %vm421_vm5, %v949_v60, 0  ;;  %1198 = vmatpush.bf16.msrb.mxu0 %v1186_v62  ;;  %1211 = vmatpush.bf16.msrb.mxu1 %v1189_v1  ;;  %v2679_v32 = vunpack.i.l.bf16 %v2678_v25  ;;  %v1229_v38 = vmul.f32 %v1227_v22, %v3088_v17  ;;  %v2463_v59 = vld [vmem:[%s3654_s4 + $0x8] sm:$0xf] }
 0x4c1   : > { %v3258_v55 = vmax.f32 %v1413_v4, 0.0  ;;  %v3260_v7 = vmax.f32 %v1414_v61, 0.0  ;;  %968 = vmatpush.bf16.msra.mxu2 %v956_v11  ;;  %981 = vmatpush.bf16.msra.mxu3 %v959_v31  ;;  %v1230_v57 = vpack.c.bf16 %v1228_v29, %v1228_v29  ;;  %v2472_v4 = vld [vmem:[%s3654_s4 + $0x14] sm:$0xf] }
 0x4c2   : > { %v1327_v43 = vsel %vm819_vm12, %v2679_v32, %v2680_v30  ;;  %v1328_v44 = vsel %vm819_vm12, %v2680_v30, %v2679_v32  ;;  %v1231_v58 = vpack.c.bf16 %v1229_v38, %v1229_v38 }
 0x4c3   : > { %v2691_v16 = vpack.i.bf16 %v3260_v7, %v3258_v55  ;;  %v1329_v60 = vpack.c.bf16 %v1328_v44, %v1327_v43  ;;  %v1238_v0 = vsel %vm421_vm5, %v1230_v57, 0 }
 0x4c4   : > { %v2673_v19 = vpop.permute.xlu1 %2672  ;;  %2459 = vmatmul.msk.bf16.vlgmr.msra.gmra.mxu2 %vm417_vm6, %v2458_v27  ;;  %2460 = vmatmul.msk.bf16.vlgmr.msra.gmra.mxu3 %vm417_vm6, %v2458_v27  ;;  %v1241_v3 = vsel %vm421_vm5, %v1231_v58, 0  ;;  %v2469_v27 = vld [vmem:[%s3654_s4 + $0x10] sm:$0xf] }
 0x4c5   : > { %1053 = vmatpush.bf16.msrb.mxu2 %v1041_v8  ;;  %1066 = vmatpush.bf16.msrb.mxu3 %v1044_v12  ;;  %v2675_v18 = vunpack.i.h.bf16 %v2673_v19  ;;  %v2674_v14 = vunpack.i.l.bf16 %v2673_v19  ;;  %v1330_v61 = vunpack.c.l.bf16 %v1329_v60  ;;  %v1331_v62 = vunpack.c.h.bf16 %v1329_v60  ;;  %v2478_v12 = vld [vmem:[%s3654_s4 + $0x1c] sm:$0xf] }
 0x4c6   : > { %2692 = vrot.lane.b32.xlu0 %v2691_v16, %s2840_s10  ;;  %2687 = vrot.lane.b32.xlu1 %v2691_v16, %s2843_s17 }
 0x4c7   : > { %2682 = vrot.lane.b32.xlu2 %v2691_v16, %s2841_s12  ;;  %v1275_v23 = vsel %vm762_vm10, %v2674_v14, %v2675_v18  ;;  %v1276_v24 = vsel %vm762_vm10, %v2675_v18, %v2674_v14  ;;  %v1332_v11 = vmul.f32 %v1330_v61, %v3134_v34  ;;  %v1333_v31 = vmul.f32 %v1331_v62, %v3136_v37 }
 0x4c8   : > { %v1277_v21 = vpack.c.bf16 %v1276_v24, %v1275_v23 }
 0x4c9   : > { %1146 = vmatpush.bf16.msra.mxu2 %v1134_v2  ;;  %1159 = vmatpush.bf16.msra.mxu3 %v1137_v5  ;;  %v1334_v1 = vpack.c.bf16 %v1332_v11, %v1332_v11  ;;  %v1335_v8 = vpack.c.bf16 %v1333_v31, %v1333_v31 }
 0x4ca   : > { %v1278_v26 = vunpack.c.l.bf16 %v1277_v21  ;;  %v1279_v28 = vunpack.c.h.bf16 %v1277_v21 }
 0x4cb   : > { %2473 = vmatmul.msk.bf16.vlgmr.msrb.gmra.mxu0 %vm417_vm6, %v2472_v4  ;;  %v1342_v9 = vsel %vm421_vm5, %v1334_v1, 0  ;;  %v1345_v15 = vsel %vm421_vm5, %v1335_v8, 0 }
 0x4cc   : > { %v1280_v33 = vmul.f32 %v1278_v26, %v3066_v49  ;;  %v1281_v35 = vmul.f32 %v1279_v28, %v3068_v50  ;;  %2474 = vmatmul.msk.bf16.vlgmr.msrb.gmra.mxu1 %vm417_vm6, %v2472_v4 }
 0x4ce   : > { %2707 = vrot.lane.b32.xlu0 %v2691_v16, %s3668_s25  ;;  %2702 = vrot.lane.b32.xlu1 %v2691_v16, %s2845_s19  ;;  %v1282_v39 = vpack.c.bf16 %v1280_v33, %v1280_v33  ;;  %v1283_v42 = vpack.c.bf16 %v1281_v35, %v1281_v35  ;;  %v2486_v35 = vld [vmem:[%s3651_s1 + $0x4] sm:$0xf] }
 0x4cf   : > { %2697 = vrot.lane.b32.xlu2 %v2691_v16, %s3664_s26  ;;  %s299_s26 = sand.u32 1, %s2828_s28  }
 0x4d0   : > { %v1290_v51 = vsel %vm421_vm5, %v1282_v39, 0  ;;  %v1293_v52 = vsel %vm421_vm5, %v1283_v42, 0  ;;  %s2346_s20 = scalar_lea.sflag [#allocation3], %s299_s26 }
 0x4d1   : > { %1302 = vmatpush.bf16.msra.mxu0 %v1290_v51  ;;  %1315 = vmatpush.bf16.msra.mxu1 %v1293_v52 }
 0x4d4   : > { %2464 = vmatmul.msk.bf16.vlgmr.msrb.gmra.mxu2 %vm417_vm6, %v2463_v59  ;;  %2465 = vmatmul.msk.bf16.vlgmr.msrb.gmra.mxu3 %vm417_vm6, %v2463_v59 }
 0x4d5   : > { %1250 = vmatpush.bf16.msrb.mxu2 %v1238_v0  ;;  %1263 = vmatpush.bf16.msrb.mxu3 %v1241_v3 }
 0x4d6   : > { %2717 = vrot.lane.b32.xlu1 %v2691_v16, %s3663_s18  ;;  %s2428_s18 = sshll.u32 %s299_s26, 5 }
 0x4d7   : > { %2712 = vrot.lane.b32.xlu2 %v2691_v16, %s3667_s24  ;;  %v2481_v16 = vld [vmem:[%s3654_s4 + $0x20] sm:$0xf]  ;;  %s3473_s13 = scalar_lea.vmem [#allocation2], %s2428_s18  ;;  %s3670_s18 = smov 111  }
 0x4db   : > { %2479 = vmatmul.msk.bf16.vlgmr.msra.gmra.mxu0 %vm417_vm6, %v2478_v12 }
 0x4dc   : > { %2480 = vmatmul.msk.bf16.vlgmr.msra.gmra.mxu1 %vm417_vm6, %v2478_v12 }
 0x4e4   : > { %2470 = vmatmul.msk.bf16.vlgmr.msra.gmra.mxu2 %vm417_vm6, %v2469_v27  ;;  %2471 = vmatmul.msk.bf16.vlgmr.msra.gmra.mxu3 %vm417_vm6, %v2469_v27 }
 0x4e5   : > { %1354 = vmatpush.bf16.msra.mxu2 %v1342_v9  ;;  %1367 = vmatpush.bf16.msra.mxu3 %v1345_v15 }
 0x4f4   : > { %2476 = vmatmul.msk.bf16.vlgmr.msrb.gmra.mxu2 %vm417_vm6, %v2475_v13  ;;  %2477 = vmatmul.msk.bf16.vlgmr.msrb.gmra.mxu3 %vm417_vm6, %v2475_v13 }
 0x504   : > { %2482 = vmatmul.msk.bf16.vlgmr.msra.gmra.mxu2 %vm417_vm6, %v2481_v16  ;;  %2483 = vmatmul.msk.bf16.vlgmr.msra.gmra.mxu3 %vm417_vm6, %v2481_v16 }
 0x521   : > { %v2683_v19 = vpop.permute.xlu2 %2682 }
 0x522   : > { %v2685_v18 = vunpack.i.h.bf16 %v2683_v19  ;;  %v2684_v14 = vunpack.i.l.bf16 %v2683_v19  ;;  %v1617_v19 = vpack.c.bf16 %v3258_v55, %v3258_v55 }
 0x524   : > { %v1435_v2 = vsel %vm395_vm3, %v2684_v14, %v2685_v18  ;;  %v1436_v5 = vsel %vm395_vm3, %v2685_v18, %v2684_v14  ;;  %v1618_v18 = vpack.c.bf16 %v3260_v7, %v3260_v7 }
 0x525   : > { %v1437_v20 = vpack.c.bf16 %v1435_v2, %v1436_v5 }
 0x527   : > { %v1438_v23 = vunpack.c.l.bf16 %v1437_v20  ;;  %v1439_v24 = vunpack.c.h.bf16 %v1437_v20 }
 0x528   : > { %v3350_v42 = vpop.f32.mrf.mxu0  ;;  %v3352_v43 = vpop.f32.mrf.mxu1 }
 0x529   : > { %v2698_v25 = vpop.permute.xlu2 %2697  ;;  %v1440_v21 = vmul.f32 %v1438_v23, %v2994_v53  ;;  %v1441_v22 = vmul.f32 %v1439_v24, %v2996_v54 }
 0x52a   : > { %v2700_v26 = vunpack.i.h.bf16 %v2698_v25  ;;  %v2699_v28 = vunpack.i.l.bf16 %v2698_v25 }
 0x52b   : > { %v1442_v29 = vpack.c.bf16 %v1440_v21, %v1440_v21  ;;  %v1443_v30 = vpack.c.bf16 %v1441_v22, %v1441_v22 }
 0x52c   : > { %v1570_v38 = vsel %vm550_vm8, %v2699_v28, %v2700_v26  ;;  %v1571_v39 = vsel %vm550_vm8, %v2700_v26, %v2699_v28 }
 0x52d   : > { %v1449_v32 = vsel %vm421_vm5, %v1442_v29, 0  ;;  %v1452_v33 = vsel %vm421_vm5, %v1443_v30, 0  ;;  %v1572_v44 = vpack.c.bf16 %v1570_v38, %v1571_v39 }
 0x52e   : > { %1461 = vmatpush.bf16.msrb.mxu0 %v1449_v32  ;;  %1474 = vmatpush.bf16.msrb.mxu1 %v1452_v33 }
 0x52f   : > { %v1573_v51 = vunpack.c.l.bf16 %v1572_v44  ;;  %v1574_v52 = vunpack.c.h.bf16 %v1572_v44 }
 0x530   : > { %v1007_v61 = vpop.f32.mrf.mxu0  ;;  %v1020_v62 = vpop.f32.mrf.mxu1 }
 0x531   : > { %2487 = vmatmul.msk.bf16.vlgmr.msrb.gmra.mxu0 %vm417_vm6, %v2486_v35  ;;  %2488 = vmatmul.msk.bf16.vlgmr.msrb.gmra.mxu1 %vm417_vm6, %v2486_v35  ;;  %v2713_v57 = vpop.permute.xlu2 %2712  ;;  %v1575_v1 = vmul.f32 %v1573_v51, %v3062_v47  ;;  %v1576_v8 = vmul.f32 %v1574_v52, %v3064_v48 }
 0x532   : > { %v2715_v11 = vunpack.i.h.bf16 %v2713_v57  ;;  %v2714_v31 = vunpack.i.l.bf16 %v2713_v57 }
 0x533   : > { %v1577_v25 = vpack.c.bf16 %v1575_v1, %v1575_v1  ;;  %v1578_v21 = vpack.c.bf16 %v1576_v8, %v1576_v8 }
 0x534   : > { %v1763_v23 = vsel %vm762_vm10, %v2714_v31, %v2715_v11  ;;  %v1764_v24 = vsel %vm762_vm10, %v2715_v11, %v2714_v31 }
 0x535   : > { %v1584_v1 = vsel %vm421_vm5, %v1577_v25, 0  ;;  %v1587_v8 = vsel %vm421_vm5, %v1578_v21, 0 }
 0x538   : > { %v2693_v58 = vpop.permute.xlu0 %2692  ;;  %v2688_v59 = vpop.permute.xlu1 %2687 }
 0x539   : > { %v2695_v60 = vunpack.i.h.bf16 %v2693_v58  ;;  %v2694_v0 = vunpack.i.l.bf16 %v2693_v58  ;;  %v2690_v3 = vunpack.i.h.bf16 %v2688_v59  ;;  %v2689_v4 = vunpack.i.l.bf16 %v2688_v59  ;;  %v3378_v38 = vpop.f32.mrf.mxu0  ;;  %v3380_v39 = vpop.f32.mrf.mxu1 }
 0x53b   : > { %v1519_v27 = vsel %vm493_vm9, %v2694_v0, %v2695_v60  ;;  %v1520_v9 = vsel %vm493_vm9, %v2695_v60, %v2694_v0  ;;  %v1421_v15 = vsel %vm365_vm4, %v2689_v4, %v2690_v3  ;;  %v1422_v12 = vsel %vm365_vm4, %v2690_v3, %v2689_v4 }
 0x53c   : > { %v1521_v13 = vpack.c.bf16 %v1519_v27, %v1520_v9  ;;  %v1423_v16 = vpack.c.bf16 %v1421_v15, %v1422_v12  ;;  %v1430_v27 = vld [vmem:[%s3651_s1] sm:$0xf] }
 0x53e   : > { %v1424_v14 = vunpack.c.l.bf16 %v1423_v16  ;;  %v1425_v2 = vunpack.c.h.bf16 %v1423_v16  ;;  %v1522_v5 = vunpack.c.l.bf16 %v1521_v13  ;;  %v1523_v20 = vunpack.c.h.bf16 %v1521_v13 }
 0x53f   : > { %v1624_v16 = vsel %vm421_vm5, %v1617_v19, 0 }
 0x540   : > { %v2708_v22 = vpop.permute.xlu0 %2707  ;;  %v2703_v26 = vpop.permute.xlu1 %2702  ;;  %v1426_v28 = vmul.f32 %v1424_v14, %v3011_v6  ;;  %v1427_v55 = vmul.f32 %v1425_v2, %v3015_v10  ;;  %v1524_v7 = vmul.f32 %v1522_v5, %v3058_v45  ;;  %v1525_v29 = vmul.f32 %v1523_v20, %v3060_v46  ;;  %v2491_v2 = vld [vmem:[%s3651_s1 + $0x8] sm:$0xf] }
 0x541   : > { %v2710_v30 = vunpack.i.h.bf16 %v2708_v22  ;;  %v2709_v32 = vunpack.i.l.bf16 %v2708_v22  ;;  %v2705_v33 = vunpack.i.h.bf16 %v2703_v26  ;;  %v2704_v35 = vunpack.i.l.bf16 %v2703_v26 }
 0x542   : > { %v1428_v44 = vpack.c.bf16 %v1426_v28, %v1426_v28  ;;  %v1429_v51 = vpack.c.bf16 %v1427_v55, %v1427_v55  ;;  %v1526_v52 = vpack.c.bf16 %v1524_v7, %v1524_v7  ;;  %v1527_v57 = vpack.c.bf16 %v1525_v29, %v1525_v29  ;;  %v1109_v28 = vpop.f32.mrf.mxu0 }
 0x543   : > { %v1712_v58 = vsel %vm705_vm11, %v2709_v32, %v2710_v30  ;;  %v1713_v59 = vsel %vm705_vm11, %v2710_v30, %v2709_v32  ;;  %v1661_v60 = vsel %vm648_vm7, %v2704_v35, %v2705_v33  ;;  %v1662_v0 = vsel %vm648_vm7, %v2705_v33, %v2704_v35  ;;  %v1122_v32 = vpop.f32.mrf.mxu1 }
 0x544   : > { %v1714_v3 = vpack.c.bf16 %v1713_v59, %v1712_v58  ;;  %v1663_v4 = vpack.c.bf16 %v1662_v0, %v1661_v60  ;;  %v1484_v61 = vsel %vm421_vm5, %v1428_v44, 0  ;;  %v1487_v62 = vsel %vm421_vm5, %v1429_v51, 0  ;;  %v2500_v32 = vld [vmem:[%s3651_s1 + $0x14] sm:$0xf] }
 0x545   : > { %1496 = vmatpush.bf16.msrb.mxu2 %v1484_v61  ;;  %1509 = vmatpush.bf16.msrb.mxu3 %v1487_v62  ;;  %v1533_v11 = vsel %vm421_vm5, %v1526_v52, 0  ;;  %v1536_v31 = vsel %vm421_vm5, %v1527_v57, 0  ;;  %v1627_v14 = vsel %vm421_vm5, %v1618_v18, 0  ;;  %v1765_v26 = vpack.c.bf16 %v1764_v24, %v1763_v23 }
 0x546   : > { %1545 = vmatpush.bf16.msra.mxu0 %v1533_v11  ;;  %1558 = vmatpush.bf16.msra.mxu1 %v1536_v31  ;;  %v1664_v9 = vunpack.c.l.bf16 %v1663_v4  ;;  %v1665_v15 = vunpack.c.h.bf16 %v1663_v4  ;;  %v1715_v12 = vunpack.c.l.bf16 %v1714_v3  ;;  %v1716_v13 = vunpack.c.h.bf16 %v1714_v3 }
 0x547   : > { %v3404_v5 = vpop.f32.mrf.mxu2  ;;  %v3406_v20 = vpop.f32.mrf.mxu3  ;;  %v1766_v59 = vunpack.c.l.bf16 %v1765_v26  ;;  %v1767_v60 = vunpack.c.h.bf16 %v1765_v26 }
 0x548   : > { %v1666_v25 = vmul.f32 %v1664_v9, %v3043_v36  ;;  %v1667_v21 = vmul.f32 %v1665_v15, %v3049_v40  ;;  %v1717_v22 = vmul.f32 %v1715_v12, %v3071_v56  ;;  %v2718_v19 = vpop.permute.xlu1 %2717  ;;  %2489 = vmatmul.msk.bf16.vlgmr.msrb.gmra.mxu2 %vm417_vm6, %v1430_v27  ;;  %2490 = vmatmul.msk.bf16.vlgmr.msrb.gmra.mxu3 %vm417_vm6, %v1430_v27  ;;  %v2494_v9 = vld [vmem:[%s3651_s1 + $0xc] sm:$0xf] }
 0x549   : > { %1596 = vmatpush.bf16.msra.mxu2 %v1584_v1  ;;  %1609 = vmatpush.bf16.msra.mxu3 %v1587_v8  ;;  %v1718_v18 = vmul.f32 %v1716_v13, %v3088_v17  ;;  %v2720_v55 = vunpack.i.h.bf16 %v2718_v19  ;;  %v2719_v7 = vunpack.i.l.bf16 %v2718_v19  ;;  %v1768_v62 = vmul.f32 %v1766_v59, %v3066_v49  ;;  %v2497_v13 = vld [vmem:[%s3651_s1 + $0x10] sm:$0xf] }
 0x54a   : > { %1636 = vmatpush.bf16.msrb.mxu0 %v1624_v16  ;;  %1649 = vmatpush.bf16.msrb.mxu1 %v1627_v14  ;;  %v1668_v29 = vpack.c.bf16 %v1666_v25, %v1666_v25  ;;  %v1669_v30 = vpack.c.bf16 %v1667_v21, %v1667_v21  ;;  %v1719_v33 = vpack.c.bf16 %v1717_v22, %v1717_v22  ;;  %v1200_v8 = vpop.f32.mrf.mxu0 }
 0x54b   : > { %2492 = vmatmul.msk.bf16.vlgmr.msra.gmra.mxu0 %vm417_vm6, %v2491_v2  ;;  %2493 = vmatmul.msk.bf16.vlgmr.msra.gmra.mxu1 %vm417_vm6, %v2491_v2  ;;  %v1720_v35 = vpack.c.bf16 %v1718_v18, %v1718_v18  ;;  %v1814_v23 = vsel %vm819_vm12, %v2719_v7, %v2720_v55  ;;  %v1815_v24 = vsel %vm819_vm12, %v2720_v55, %v2719_v7  ;;  %v1213_v27 = vpop.f32.mrf.mxu1 }
 0x54c   : > { %v1675_v44 = vsel %vm421_vm5, %v1668_v29, 0  ;;  %v1678_v51 = vsel %vm421_vm5, %v1669_v30, 0  ;;  %v1816_v52 = vpack.c.bf16 %v1815_v24, %v1814_v23  ;;  %v1726_v57 = vsel %vm421_vm5, %v1719_v33, 0  ;;  %v2503_v33 = vld [vmem:[%s3651_s1 + $0x18] sm:$0xf] }
 0x54d   : > { %1687 = vmatpush.bf16.msrb.mxu2 %v1675_v44  ;;  %1700 = vmatpush.bf16.msrb.mxu3 %v1678_v51  ;;  %v1729_v58 = vsel %vm421_vm5, %v1720_v35, 0  ;;  %v1769_v11 = vmul.f32 %v1767_v60, %v3068_v50  ;;  %v1770_v15 = vpack.c.bf16 %v1768_v62, %v1768_v62  ;;  %v1006_v24 = vadd.f32 %v3350_v42, %v3404_v5  ;;  %v2509_v42 = vld [vmem:[%s3651_s1 + $0x20] sm:$0xf] }
 0x54e   : > { %1738 = vmatpush.bf16.msra.mxu0 %v1726_v57  ;;  %1751 = vmatpush.bf16.msra.mxu1 %v1729_v58  ;;  %v1817_v0 = vunpack.c.l.bf16 %v1816_v52  ;;  %v1818_v3 = vunpack.c.h.bf16 %v1816_v52  ;;  %v1019_v44 = vadd.f32 %v3352_v43, %v3406_v20 }
 0x54f   : > { %v972_v4 = vpop.f32.mrf.mxu2  ;;  %v985_v61 = vpop.f32.mrf.mxu3  ;;  %v1771_v12 = vpack.c.bf16 %v1769_v11, %v1769_v11  ;;  %v1777_v21 = vsel %vm421_vm5, %v1770_v15, 0 }
 0x550   : > { %v1819_v31 = vmul.f32 %v1817_v0, %v3134_v34  ;;  %v1820_v1 = vmul.f32 %v1818_v3, %v3136_v37  ;;  %v2506_v4 = vld [vmem:[%s3651_s1 + $0x1c] sm:$0xf] }
 0x551   : > { %v1780_v22 = vsel %vm421_vm5, %v1771_v12, 0 }
 0x552   : > { %v1821_v16 = vpack.c.bf16 %v1819_v31, %v1819_v31  ;;  %v1822_v14 = vpack.c.bf16 %v1820_v1, %v1820_v1  ;;  %v1202_v18 = vpop.f32.mrf.mxu0 }
 0x553   : > { %v1215_v28 = vpop.f32.mrf.mxu1 }
 0x554   : > { %v1828_v26 = vsel %vm421_vm5, %v1821_v16, 0  ;;  %v1831_v19 = vsel %vm421_vm5, %v1822_v14, 0 }
 0x557   : > { %v1055_v2 = vpop.f32.mrf.mxu2  ;;  %v1068_v25 = vpop.f32.mrf.mxu3 }
 0x558   : > { %2495 = vmatmul.msk.bf16.vlgmr.msra.gmra.mxu2 %vm417_vm6, %v2494_v9  ;;  %2496 = vmatmul.msk.bf16.vlgmr.msra.gmra.mxu3 %vm417_vm6, %v2494_v9  ;;  %v1072_v59 = vadd.f32 %v1055_v2, %v1006_v24  ;;  %v1073_v60 = vadd.f32 %v1068_v25, %v1019_v44  ;;  %v2769_v2 = vld [vmem:[%s2945_s21] sm:$0xff] }
 0x559   : > { %1789 = vmatpush.bf16.msra.mxu2 %v1777_v21  ;;  %1802 = vmatpush.bf16.msra.mxu3 %v1780_v22  ;;  %v2770_v21 = vld [vmem:[%s2945_s21 + $0x8] sm:$0xff] }
 0x55a   : > { %v1304_v29 = vpop.f32.mrf.mxu0  ;;  %v1124_v0 = vadd.f32 %v3378_v38, %v1072_v59  ;;  %v1125_v3 = vadd.f32 %v3380_v39, %v1073_v60 }
 0x55b   : > { %2498 = vmatmul.msk.bf16.vlgmr.msrb.gmra.mxu0 %vm417_vm6, %v2497_v13  ;;  %2499 = vmatmul.msk.bf16.vlgmr.msrb.gmra.mxu1 %vm417_vm6, %v2497_v13  ;;  %v1317_v30 = vpop.f32.mrf.mxu1 }
 0x55c   : > { %1840 = vmatpush.bf16.msrb.mxu0 %v1828_v26  ;;  %1853 = vmatpush.bf16.msrb.mxu1 %v1831_v19 }
 0x55f   : > { %v1057_v55 = vpop.f32.mrf.mxu2  ;;  %v1070_v7 = vpop.f32.mrf.mxu3 }
 0x562   : > { %v1306_v51 = vpop.f32.mrf.mxu0 }
 0x563   : > { %v1319_v52 = vpop.f32.mrf.mxu1 }
 0x567   : > { %v1148_v35 = vpop.f32.mrf.mxu2  ;;  %v1161_v23 = vpop.f32.mrf.mxu3 }
 0x568   : > { %2501 = vmatmul.msk.bf16.vlgmr.msrb.gmra.mxu2 %vm417_vm6, %v2500_v32  ;;  %2502 = vmatmul.msk.bf16.vlgmr.msrb.gmra.mxu3 %vm417_vm6, %v2500_v32  ;;  %v1165_v20 = vadd.f32 %v1148_v35, %v1124_v0  ;;  %v1166_v61 = vadd.f32 %v1161_v23, %v1125_v3 }
 0x56a   : > { %v1217_v38 = vadd.f32 %v1200_v8, %v1165_v20  ;;  %v1218_v39 = vadd.f32 %v1213_v27, %v1166_v61 }
 0x56b   : > { %2504 = vmatmul.msk.bf16.vlgmr.msra.gmra.mxu0 %vm417_vm6, %v2503_v33  ;;  %2505 = vmatmul.msk.bf16.vlgmr.msra.gmra.mxu1 %vm417_vm6, %v2503_v33 }
 0x56f   : > { %v1150_v57 = vpop.f32.mrf.mxu2  ;;  %v1163_v58 = vpop.f32.mrf.mxu3 }
 0x577   : > { %v1252_v43 = vpop.f32.mrf.mxu2  ;;  %v1265_v5 = vpop.f32.mrf.mxu3 }
 0x578   : > { %2507 = vmatmul.msk.bf16.vlgmr.msra.gmra.mxu2 %vm417_vm6, %v2506_v4  ;;  %2508 = vmatmul.msk.bf16.vlgmr.msra.gmra.mxu3 %vm417_vm6, %v2506_v4  ;;  %v1269_v31 = vadd.f32 %v1252_v43, %v1217_v38  ;;  %v1270_v1 = vadd.f32 %v1265_v5, %v1218_v39 }
 0x57a   : > { %v1321_v9 = vadd.f32 %v1304_v29, %v1269_v31  ;;  %v1322_v15 = vadd.f32 %v1317_v30, %v1270_v1 }
 0x57b   : > { %2510 = vmatmul.msk.bf16.vlgmr.msrb.gmra.mxu0 %vm417_vm6, %v2509_v42  ;;  %2511 = vmatmul.msk.bf16.vlgmr.msrb.gmra.mxu1 %vm417_vm6, %v2509_v42 }
 0x57f   : > { %v1254_v62 = vpop.f32.mrf.mxu2  ;;  %v1267_v11 = vpop.f32.mrf.mxu3 }
 0x587   : > { %v1356_v12 = vpop.f32.mrf.mxu2  ;;  %v1369_v13 = vpop.f32.mrf.mxu3 }
 0x588   : > { %v1373_v16 = vadd.f32 %v1356_v12, %v1321_v9  ;;  %v1374_v14 = vadd.f32 %v1369_v13, %v1322_v15 }
 0x58a   : > { %v1375_v25 = vadd.f32 %v2769_v2, %v1373_v16  ;;  %v1376_v22 = vadd.f32 %v2770_v21, %v1374_v14 }
 0x58c   : > { %1377 = vst [vmem:[%s3473_s13] sm:$0xff] %v1375_v25 }
 0x58d   : > { %1378 = vst [vmem:[%s3473_s13 + $0x8] sm:$0xff] %v1376_v22 }
 0x58f   : > { %v1358_v8 = vpop.f32.mrf.mxu2  ;;  %v1371_v27 = vpop.f32.mrf.mxu3 }
 0x5ae   : > { %v1463_v26 = vpop.f32.mrf.mxu0  ;;  %v1476_v19 = vpop.f32.mrf.mxu1 }
 0x5b6   : > { %v1465_v18 = vpop.f32.mrf.mxu0  ;;  %v1478_v28 = vpop.f32.mrf.mxu1 }
 0x5c8   : > { %v1547_v55 = vpop.f32.mrf.mxu0  ;;  %v1560_v7 = vpop.f32.mrf.mxu1 }
 0x5cb   : > { %v1498_v29 = vpop.f32.mrf.mxu2  ;;  %v1511_v30 = vpop.f32.mrf.mxu3 }
 0x5cc   : > { %v1499_v4 = vadd.f32 %v1498_v29, %v1463_v26  ;;  %v1512_v42 = vadd.f32 %v1511_v30, %v1476_v19 }
 0x5ce   : > { %v1564_v20 = vadd.f32 %v1547_v55, %v1499_v4  ;;  %v1565_v61 = vadd.f32 %v1560_v7, %v1512_v42 }
 0x5d0   : > { %v1549_v32 = vpop.f32.mrf.mxu0  ;;  %v1562_v33 = vpop.f32.mrf.mxu1 }
 0x5d3   : > { %v1500_v35 = vpop.f32.mrf.mxu2  ;;  %v1513_v23 = vpop.f32.mrf.mxu3 }
 0x5d8   : > { %v1638_v24 = vpop.f32.mrf.mxu0  ;;  %v1651_v44 = vpop.f32.mrf.mxu1 }
 0x5db   : > { %v1598_v51 = vpop.f32.mrf.mxu2  ;;  %v1611_v52 = vpop.f32.mrf.mxu3 }
 0x5dc   : > { %v1615_v62 = vadd.f32 %v1598_v51, %v1564_v20  ;;  %v1616_v11 = vadd.f32 %v1611_v52, %v1565_v61 }
 0x5de   : > { %v1655_v9 = vadd.f32 %v1638_v24, %v1615_v62  ;;  %v1656_v15 = vadd.f32 %v1651_v44, %v1616_v11 }
 0x5e0   : > { %v1640_v57 = vpop.f32.mrf.mxu0  ;;  %v1653_v58 = vpop.f32.mrf.mxu1 }
 0x5e3   : > { %v1600_v59 = vpop.f32.mrf.mxu2  ;;  %v1613_v60 = vpop.f32.mrf.mxu3 }
 0x5e8   : > { %v1740_v0 = vpop.f32.mrf.mxu0  ;;  %v1753_v3 = vpop.f32.mrf.mxu1 }
 0x5eb   : > { %v1689_v43 = vpop.f32.mrf.mxu2  ;;  %v1702_v5 = vpop.f32.mrf.mxu3 }
 0x5ec   : > { %v1706_v12 = vadd.f32 %v1689_v43, %v1655_v9  ;;  %v1707_v13 = vadd.f32 %v1702_v5, %v1656_v15  ;;  %v2771_v43 = vld [vmem:[%s3655_s5] sm:$0xff] }
 0x5ee   : > { %v1757_v2 = vadd.f32 %v1740_v0, %v1706_v12  ;;  %v1758_v25 = vadd.f32 %v1753_v3, %v1707_v13 }
 0x5f0   : > { %v1742_v38 = vpop.f32.mrf.mxu0  ;;  %v1755_v39 = vpop.f32.mrf.mxu1 }
 0x5f3   : > { %v1691_v31 = vpop.f32.mrf.mxu2  ;;  %v1704_v1 = vpop.f32.mrf.mxu3 }
 0x5f8   : > { %v1842_v16 = vpop.f32.mrf.mxu0  ;;  %v1855_v14 = vpop.f32.mrf.mxu1 }
 0x5fb   : > { %v1791_v21 = vpop.f32.mrf.mxu2  ;;  %v1804_v22 = vpop.f32.mrf.mxu3 }
 0x5fc   : > { %v1808_v8 = vadd.f32 %v1791_v21, %v1757_v2  ;;  %v1809_v27 = vadd.f32 %v1804_v22, %v1758_v25 }
 0x5fe   : > { %v1859_v26 = vadd.f32 %v1842_v16, %v1808_v8  ;;  %v1860_v19 = vadd.f32 %v1855_v14, %v1809_v27 }
 0x600   : > { %v1844_v18 = vpop.f32.mrf.mxu0  ;;  %v1857_v28 = vpop.f32.mrf.mxu1  ;;  %v1861_v55 = vadd.f32 %v1860_v19, %v1859_v26 }
 0x602   : > { %1862 = vadd.xlane.f32.xlu0 %v1861_v55 }
 0x603   : > { %v1793_v7 = vpop.f32.mrf.mxu2  ;;  %v1806_v29 = vpop.f32.mrf.mxu3 }
 0x675   : > { %v1863_v30 = vpop.xlane.xlu0 %1862 }
 0x676   : > { %v1864_v32 = vmul.f32 0.00390625, %v1863_v30 }
 0x678   : > { %v1865_v33 = vsub.f32 %v1859_v26, %v1864_v32  ;;  %v1866_v35 = vsub.f32 %v1860_v19, %v1864_v32 }
 0x67a   : > { %v1867_v23 = vmul.f32 %v1865_v33, %v1865_v33  ;;  %v1868_v24 = vmul.f32 %v1866_v35, %v1866_v35 }
 0x67c   : > { %v1869_v44 = vadd.f32 %v1868_v24, %v1867_v23 }
 0x67e   : > { %1870 = vadd.xlane.f32.xlu2 %v1869_v44 }
 0x6f1   : > { %v1871_v51 = vpop.xlane.xlu2 %1870 }
 0x6f2   : > { %v1872_v52 = vmul.f32 0.00390625, %v1871_v51 }
 0x6f4   : > { %v1873_v57 = vadd.f32 1e-05, %v1872_v52 }
 0x6f6   : > { %2767 = vrsqrt.f32 %v1873_v57  ;;  %vm1880_vm14 = vweird.f32 %v1873_v57 }
 0x6fc   : > { %v2768_v58 = vpop.eup %2767 }
 0x6fd   : > { %v1875_v59 = vmul.f32 %v2768_v58, %v1873_v57  ;;  %vm1881_vm13 = vweird.f32 %v2768_v58 }
 0x6fe   : > { %vm1882_vm15 = vmor %vm1880_vm14, %vm1881_vm13 }
 0x6ff   : > { %v1876_v60 = vmul.f32 %v2768_v58, %v1875_v59 }
 0x701   : > { %v1877_v0 = vmul.f32 0.5, %v1876_v60 }
 0x703   : > { %v1878_v3 = vsub.f32 1.5, %v1877_v0 }
 0x705   : > { %v1879_v4 = vmul.f32 %v2768_v58, %v1878_v3 }
 0x707   : > { %v1883_v42 = vsel %vm1882_vm15, %v2768_v58, %v1879_v4 }
 0x708   : > { %v1884_v5 = vmul.f32 %v2771_v43, %v1883_v42 }
 0x70a   : > { %1887 = vperm.xlu1 %2598, %v1884_v5  }
 0x77c   : > { %v1888_v20 = vpop.permute.xlu1 %1887 }
 0x77d   : > { %v1890_v61 = vmul.f32 %v1888_v20, %v1865_v33  ;;  %v1891_v38 = vmul.f32 %v1888_v20, %v1866_v35 }
 0x77f   : > { %v1892_v39 = vadd.f32 %v1890_v61, %v3183_v63  ;;  %v1893_v62 = vadd.f32 %v1891_v38, %v3183_v63 }
 0x781   : > { %v3482_v11 = vmax.f32 %v1892_v39, 0.0  ;;  %v3484_v31 = vmax.f32 %v1893_v62, 0.0 }
 0x783   : > { %v2746_v1 = vpack.i.bf16 %v3484_v31, %v3482_v11  ;;  %v2096_v58 = vpack.c.bf16 %v3482_v11, %v3482_v11  ;;  %v2097_v5 = vpack.c.bf16 %v3484_v31, %v3484_v31 }
 0x785   : > { %2747 = vrot.lane.b32.xlu2 %v2746_v1, %s2845_s19  ;;  %2742 = vrot.lane.b32.xlu0 %v2746_v1, %s3668_s25  ;;  %v2106_v31 = vsel %vm421_vm5, %v2097_v5, 0  ;;  %s2359_s25 = sshll.u32 %s3473_s13, 4  ;;  %s2360_s25 = int_to_ptr.vmem [resolvable:$true] %s2359_s25 }
 0x786   : > { %2722 = vrot.lane.b32.xlu1 %v2746_v1, %s2841_s12 }
 0x78e   : > { %2727 = vrot.lane.b32.xlu1 %v2746_v1, %s2840_s10  ;;  %s2548_s10 = sshll.u32 %s2914_s9, 5 }
 0x796   : > { %2732 = vrot.lane.b32.xlu1 %v2746_v1, %s2843_s17  ;;  %s2794_s17 = scalar_lea.hbm %s3658_s8, 64 }
 0x79e   : > { %2737 = vrot.lane.b32.xlu1 %v2746_v1, %s3669_s23 }
 0x7a6   : > { %2752 = vrot.lane.b32.xlu1 %v2746_v1, %s3670_s18 }
 0x7ae   : > { %2757 = vrot.lane.b32.xlu1 %v2746_v1, %s3667_s24  ;;  %v2103_v1 = vsel %vm421_vm5, %v2096_v58, 0  ;;  %s2358_s24 = scalar_lea.hbm %s3658_s8, %s2548_s10 }
 0x7af   : > { %s2361_s9 = sshll.u32 %s2358_s24, 4  ;;  %s2362_s9 = int_to_ptr.hbm [resolvable:$true] %s2361_s9 }
 0x7b0   : > { %s2788_s22 = sshra.s32 %s2362_s9, 4  ;;  %s2789_s22 = int_to_ptr.hbm [resolvable:$true] %s2788_s22 }
 0x7b1   : > { %s2790_s23 = scalar_lea.hbm %s2789_s22, 32  ;;  %p2795_p0 = scmp.lt.s32.totalorder %s2789_s22, %s3658_s8 }
 0x7b2   : > { %p2791_p11 = scmp.ne.s32.totalorder %s2789_s22, %s2790_s23  ;;  %p2796_p1 = scmp.lt.s32.totalorder %s2794_s17, %s2790_s23 }
 0x7b4   : > { %p2792_p12 = pnand %p2791_p11, %p2931_p5  ;;  %p2797_p2 = por %p2796_p1, %p2795_p0 }
 0x7b6   : > { %p2793_p13 = pneg %p2792_p12 }
 0x7b8   : > { %p2798_p3 = pnand %p2797_p2, %p2793_p13 }
 0x7df   : > { %v2748_v21 = vpop.permute.xlu2 %2747 }
 0x7e0   : > { %v2750_v29 = vunpack.i.h.bf16 %v2748_v21  ;;  %v2749_v30 = vunpack.i.l.bf16 %v2748_v21 }
 0x7e2   : > { %v2140_v57 = vsel %vm648_vm7, %v2749_v30, %v2750_v29  ;;  %v2141_v59 = vsel %vm648_vm7, %v2750_v29, %v2749_v30 }
 0x7e3   : > { %v2142_v38 = vpack.c.bf16 %v2141_v59, %v2140_v57 }
 0x7f7   : > { %v2743_v25 = vpop.permute.xlu0 %2742 }
 0x7f8   : > { %v2723_v63 = vpop.permute.xlu1 %2722  ;;  %v2745_v18 = vunpack.i.h.bf16 %v2743_v25  ;;  %v2744_v28 = vunpack.i.l.bf16 %v2743_v25  ;;  %v2144_v25 = vunpack.c.h.bf16 %v2142_v38 }
 0x7f9   : > { %v2725_v9 = vunpack.i.h.bf16 %v2723_v63  ;;  %v2724_v15 = vunpack.i.l.bf16 %v2723_v63 }
 0x7fa   : > { %v2191_v24 = vsel %vm705_vm11, %v2744_v28, %v2745_v18  ;;  %v2192_v44 = vsel %vm705_vm11, %v2745_v18, %v2744_v28  ;;  %v2146_v29 = vmul.f32 %v2144_v25, %v3049_v40  ;;  %v2532_v25 = vld [vmem:[%s3654_s4 + $0x1c] sm:$0xf] }
 0x7fb   : > { %v1914_v12 = vsel %vm395_vm3, %v2724_v15, %v2725_v9  ;;  %v1915_v13 = vsel %vm395_vm3, %v2725_v9, %v2724_v15  ;;  %v2193_v4 = vpack.c.bf16 %v2192_v44, %v2191_v24 }
 0x7fc   : > { %v1916_v16 = vpack.c.bf16 %v1914_v12, %v1915_v13  ;;  %v2143_v13 = vunpack.c.l.bf16 %v2142_v38 }
 0x7fd   : > { %v2194_v63 = vunpack.c.l.bf16 %v2193_v4  ;;  %v2195_v9 = vunpack.c.h.bf16 %v2193_v4 }
 0x7fe   : > { %v1917_v14 = vunpack.c.l.bf16 %v1916_v16  ;;  %v1918_v2 = vunpack.c.h.bf16 %v1916_v16 }
 0x800   : > { %v2728_v22 = vpop.permute.xlu1 %2727  ;;  %v1919_v8 = vmul.f32 %v1917_v14, %v2994_v53  ;;  %v1920_v27 = vmul.f32 %v1918_v2, %v2996_v54  ;;  %v2512_v54 = vld [vmem:[%s3654_s4 + $0x4] sm:$0xf] }
 0x801   : > { %v2730_v26 = vunpack.i.h.bf16 %v2728_v22  ;;  %v2729_v19 = vunpack.i.l.bf16 %v2728_v22 }
 0x802   : > { %v1921_v55 = vpack.c.bf16 %v1919_v8, %v1919_v8  ;;  %v1922_v7 = vpack.c.bf16 %v1920_v27, %v1920_v27  ;;  %v2196_v8 = vmul.f32 %v2194_v63, %v3071_v56  ;;  %v2197_v27 = vmul.f32 %v2195_v9, %v3088_v17  ;;  %v1909_v56 = vld [vmem:[%s3654_s4] sm:$0xf]  ;;  %v2523_v63 = vld [vmem:[%s3654_s4 + $0x10] sm:$0xf] }
 0x803   : > { %v1998_v32 = vsel %vm493_vm9, %v2729_v19, %v2730_v26  ;;  %v1999_v33 = vsel %vm493_vm9, %v2730_v26, %v2729_v19 }
 0x804   : > { %v2000_v35 = vpack.c.bf16 %v1998_v32, %v1999_v33  ;;  %v1928_v23 = vsel %vm421_vm5, %v1921_v55, 0  ;;  %v1931_v53 = vsel %vm421_vm5, %v1922_v7, 0  ;;  %v2145_v55 = vmul.f32 %v2143_v13, %v3043_v36  ;;  %v2517_v32 = vld [vmem:[%s3654_s4 + $0x8] sm:$0xf] }
 0x805   : > { %1940 = vmatpush.bf16.msrb.mxu2 %v1928_v23  ;;  %1953 = vmatpush.bf16.msrb.mxu3 %v1931_v53  ;;  %v2198_v17 = vpack.c.bf16 %v2196_v8, %v2196_v8  ;;  %v2199_v30 = vpack.c.bf16 %v2197_v27, %v2197_v27 }
 0x806   : > { %v2001_v51 = vunpack.c.l.bf16 %v2000_v35  ;;  %v2002_v52 = vunpack.c.h.bf16 %v2000_v35  ;;  %v2147_v35 = vpack.c.bf16 %v2145_v55, %v2145_v55 }
 0x808   : > { %v2733_v60 = vpop.permute.xlu1 %2732  ;;  %2513 = vmatmul.msk.bf16.vlgmr.msrb.gmra.mxu2 %vm417_vm6, %v2512_v54  ;;  %2514 = vmatmul.msk.bf16.vlgmr.msrb.gmra.mxu3 %vm417_vm6, %v2512_v54  ;;  %v2003_v0 = vmul.f32 %v2001_v51, %v3058_v45  ;;  %v2004_v3 = vmul.f32 %v2002_v52, %v3060_v46  ;;  %v2148_v54 = vpack.c.bf16 %v2146_v29, %v2146_v29  ;;  %v2205_v51 = vsel %vm421_vm5, %v2198_v17, 0 }
 0x809   : > { %v2735_v42 = vunpack.i.h.bf16 %v2733_v60  ;;  %v2734_v43 = vunpack.i.l.bf16 %v2733_v60  ;;  %v2208_v52 = vsel %vm421_vm5, %v2199_v30, 0 }
 0x80a   : > { %v2005_v20 = vpack.c.bf16 %v2003_v0, %v2003_v0  ;;  %v2006_v61 = vpack.c.bf16 %v2004_v3, %v2004_v3  ;;  %v2154_v3 = vsel %vm421_vm5, %v2147_v35, 0  ;;  %v2157_v4 = vsel %vm421_vm5, %v2148_v54, 0 }
 0x80b   : > { %v1900_v39 = vsel %vm365_vm4, %v2734_v43, %v2735_v42  ;;  %v1901_v62 = vsel %vm365_vm4, %v2735_v42, %v2734_v43 }
 0x80c   : > { %v1902_v11 = vpack.c.bf16 %v1900_v39, %v1901_v62  ;;  %v2012_v45 = vsel %vm421_vm5, %v2005_v20, 0  ;;  %v2015_v46 = vsel %vm421_vm5, %v2006_v61, 0 }
 0x80d   : > { %2024 = vmatpush.bf16.msra.mxu2 %v2012_v45  ;;  %2037 = vmatpush.bf16.msra.mxu3 %v2015_v46  ;;  %v2520_v46 = vld [vmem:[%s3654_s4 + $0xc] sm:$0xf] }
 0x80e   : > { %v1903_v15 = vunpack.c.l.bf16 %v1902_v11  ;;  %v1904_v12 = vunpack.c.h.bf16 %v1902_v11 }
 0x810   : > { %v2738_v16 = vpop.permute.xlu1 %2737  ;;  %v1905_v14 = vmul.f32 %v1903_v15, %v3011_v6  ;;  %v1906_v2 = vmul.f32 %v1904_v12, %v3015_v10 }
 0x811   : > { %2115 = vmatpush.bf16.msrb.mxu2 %v2103_v1  ;;  %2128 = vmatpush.bf16.msrb.mxu3 %v2106_v31  ;;  %v2740_v21 = vunpack.i.h.bf16 %v2738_v16  ;;  %v2739_v22 = vunpack.i.l.bf16 %v2738_v16 }
 0x812   : > { %v1907_v26 = vpack.c.bf16 %v1905_v14, %v1905_v14  ;;  %v1908_v19 = vpack.c.bf16 %v1906_v2, %v1906_v2 }
 0x813   : > { %v2049_v18 = vsel %vm550_vm8, %v2739_v22, %v2740_v21  ;;  %v2050_v28 = vsel %vm550_vm8, %v2740_v21, %v2739_v22  ;;  %v2535_v21 = vld [vmem:[%s3654_s4 + $0x20] sm:$0xf] }
 0x814   : > { %v2051_v6 = vpack.c.bf16 %v2049_v18, %v2050_v28  ;;  %v1963_v10 = vsel %vm421_vm5, %v1907_v26, 0  ;;  %v1966_v7 = vsel %vm421_vm5, %v1908_v19, 0 }
 0x815   : > { %1975 = vmatpush.bf16.msra.mxu0 %v1963_v10  ;;  %1988 = vmatpush.bf16.msra.mxu1 %v1966_v7 }
 0x816   : > { %v2052_v36 = vunpack.c.l.bf16 %v2051_v6  ;;  %v2053_v33 = vunpack.c.h.bf16 %v2051_v6 }
 0x818   : > { %v2753_v23 = vpop.permute.xlu1 %2752  ;;  %2515 = vmatmul.msk.bf16.vlgmr.msra.gmra.mxu0 %vm417_vm6, %v1909_v56  ;;  %2516 = vmatmul.msk.bf16.vlgmr.msra.gmra.mxu1 %vm417_vm6, %v1909_v56  ;;  %v2054_v40 = vmul.f32 %v2052_v36, %v3062_v47  ;;  %v2055_v53 = vmul.f32 %v2053_v33, %v3064_v48 }
 0x819   : > { %v2755_v24 = vunpack.i.h.bf16 %v2753_v23  ;;  %v2754_v44 = vunpack.i.l.bf16 %v2753_v23  ;;  %2518 = vmatmul.msk.bf16.vlgmr.msra.gmra.mxu2 %vm417_vm6, %v2517_v32  ;;  %2519 = vmatmul.msk.bf16.vlgmr.msra.gmra.mxu3 %vm417_vm6, %v2517_v32 }
 0x81a   : > { %2217 = vmatpush.bf16.msra.mxu2 %v2205_v51  ;;  %2230 = vmatpush.bf16.msra.mxu3 %v2208_v52  ;;  %v2056_v57 = vpack.c.bf16 %v2054_v40, %v2054_v40  ;;  %v2057_v58 = vpack.c.bf16 %v2055_v53, %v2055_v53 }
 0x81b   : > { %v2293_v47 = vsel %vm819_vm12, %v2754_v44, %v2755_v24  ;;  %v2294_v48 = vsel %vm819_vm12, %v2755_v24, %v2754_v44 }
 0x81c   : > { %v2295_v59 = vpack.c.bf16 %v2294_v48, %v2293_v47  ;;  %v2063_v60 = vsel %vm421_vm5, %v2056_v57, 0  ;;  %v2066_v0 = vsel %vm421_vm5, %v2057_v58, 0 }
 0x81d   : > { %2075 = vmatpush.bf16.msrb.mxu0 %v2063_v60  ;;  %2088 = vmatpush.bf16.msrb.mxu1 %v2066_v0 }
 0x81e   : > { %v2296_v42 = vunpack.c.l.bf16 %v2295_v59  ;;  %v2297_v43 = vunpack.c.h.bf16 %v2295_v59 }
 0x820   : > { %v2758_v5 = vpop.permute.xlu1 %2757  ;;  %v2298_v38 = vmul.f32 %v2296_v42, %v3134_v34  ;;  %v2299_v39 = vmul.f32 %v2297_v43, %v3136_v37 }
 0x821   : > { %2166 = vmatpush.bf16.msra.mxu0 %v2154_v3  ;;  %2179 = vmatpush.bf16.msra.mxu1 %v2157_v4  ;;  %v2760_v20 = vunpack.i.h.bf16 %v2758_v5  ;;  %v2759_v61 = vunpack.i.l.bf16 %v2758_v5 }
 0x822   : > { %v2300_v1 = vpack.c.bf16 %v2298_v38, %v2298_v38  ;;  %v2301_v31 = vpack.c.bf16 %v2299_v39, %v2299_v39 }
 0x823   : > { %v2242_v62 = vsel %vm762_vm10, %v2759_v61, %v2760_v20  ;;  %v2243_v11 = vsel %vm762_vm10, %v2760_v20, %v2759_v61 }
 0x824   : > { %v2244_v45 = vpack.c.bf16 %v2243_v11, %v2242_v62  ;;  %v2307_v15 = vsel %vm421_vm5, %v2300_v1, 0  ;;  %v2310_v12 = vsel %vm421_vm5, %v2301_v31, 0 }
 0x826   : > { %v2245_v34 = vunpack.c.l.bf16 %v2244_v45  ;;  %v2246_v9 = vunpack.c.h.bf16 %v2244_v45 }
 0x828   : > { %2521 = vmatmul.msk.bf16.vlgmr.msrb.gmra.mxu0 %vm417_vm6, %v2520_v46  ;;  %2522 = vmatmul.msk.bf16.vlgmr.msrb.gmra.mxu1 %vm417_vm6, %v2520_v46  ;;  %v2247_v41 = vmul.f32 %v2245_v34, %v3066_v49  ;;  %v2248_v37 = vmul.f32 %v2246_v9, %v3068_v50  ;;  %v2526_v49 = vld [vmem:[%s3654_s4 + $0x14] sm:$0xf]  ;;  %v2529_v50 = vld [vmem:[%s3654_s4 + $0x18] sm:$0xf] }
 0x829   : > { %2524 = vmatmul.msk.bf16.vlgmr.msrb.gmra.mxu2 %vm417_vm6, %v2523_v63  ;;  %2525 = vmatmul.msk.bf16.vlgmr.msrb.gmra.mxu3 %vm417_vm6, %v2523_v63  ;;  %v2772_v34 = vld [vmem:[%s2945_s21 + $0x10] sm:$0xff] }
 0x82a   : > { %2319 = vmatpush.bf16.msrb.mxu2 %v2307_v15  ;;  %2332 = vmatpush.bf16.msrb.mxu3 %v2310_v12  ;;  %v2249_v13 = vpack.c.bf16 %v2247_v41, %v2247_v41  ;;  %v2250_v16 = vpack.c.bf16 %v2248_v37, %v2248_v37  ;;  %v2773_v41 = vld [vmem:[%s2945_s21 + $0x18] sm:$0xff] }
 0x82c   : > { %v2256_v14 = vsel %vm421_vm5, %v2249_v13, 0  ;;  %v2259_v2 = vsel %vm421_vm5, %v2250_v16, 0 }
 0x82d   : > { %2268 = vmatpush.bf16.msrb.mxu0 %v2256_v14  ;;  %2281 = vmatpush.bf16.msrb.mxu1 %v2259_v2 }
 0x838   : > { %2527 = vmatmul.msk.bf16.vlgmr.msra.gmra.mxu0 %vm417_vm6, %v2526_v49  ;;  %2528 = vmatmul.msk.bf16.vlgmr.msra.gmra.mxu1 %vm417_vm6, %v2526_v49 }
 0x839   : > { %2530 = vmatmul.msk.bf16.vlgmr.msra.gmra.mxu2 %vm417_vm6, %v2529_v50  ;;  %2531 = vmatmul.msk.bf16.vlgmr.msra.gmra.mxu3 %vm417_vm6, %v2529_v50 }
 0x848   : > { %2533 = vmatmul.msk.bf16.vlgmr.msrb.gmra.mxu0 %vm417_vm6, %v2532_v25  ;;  %2534 = vmatmul.msk.bf16.vlgmr.msrb.gmra.mxu1 %vm417_vm6, %v2532_v25 }
 0x849   : > { %2536 = vmatmul.msk.bf16.vlgmr.msrb.gmra.mxu2 %vm417_vm6, %v2535_v21  ;;  %2537 = vmatmul.msk.bf16.vlgmr.msrb.gmra.mxu3 %vm417_vm6, %v2535_v21 }
 0x88b   : > { %v1942_v22 = vpop.f32.mrf.mxu2  ;;  %v1955_v8 = vpop.f32.mrf.mxu3 }
 0x893   : > { %v1944_v27 = vpop.f32.mrf.mxu2  ;;  %v1957_v26 = vpop.f32.mrf.mxu3 }
 0x895   : > { %v1977_v19 = vpop.f32.mrf.mxu0  ;;  %v1990_v18 = vpop.f32.mrf.mxu1 }
 0x896   : > { %v1978_v52 = vadd.f32 %v1977_v19, %v1942_v22  ;;  %v1991_v57 = vadd.f32 %v1990_v18, %v1955_v8 }
 0x89c   : > { %v2026_v28 = vpop.f32.mrf.mxu2  ;;  %v2039_v55 = vpop.f32.mrf.mxu3 }
 0x89d   : > { %v1979_v6 = vpop.f32.mrf.mxu0  ;;  %v1992_v10 = vpop.f32.mrf.mxu1  ;;  %v2043_v58 = vadd.f32 %v2026_v28, %v1978_v52  ;;  %v2044_v47 = vadd.f32 %v2039_v55, %v1991_v57 }
 0x8a4   : > { %v2028_v7 = vpop.f32.mrf.mxu2  ;;  %v2041_v29 = vpop.f32.mrf.mxu3 }
 0x8a5   : > { %v2077_v56 = vpop.f32.mrf.mxu0  ;;  %v2090_v17 = vpop.f32.mrf.mxu1 }
 0x8a6   : > { %v2094_v48 = vadd.f32 %v2077_v56, %v2043_v58  ;;  %v2095_v59 = vadd.f32 %v2090_v17, %v2044_v47 }
 0x8ac   : > { %v2117_v30 = vpop.f32.mrf.mxu2  ;;  %v2130_v32 = vpop.f32.mrf.mxu3 }
 0x8ad   : > { %v2079_v36 = vpop.f32.mrf.mxu0  ;;  %v2092_v33 = vpop.f32.mrf.mxu1  ;;  %v2134_v3 = vadd.f32 %v2117_v30, %v2094_v48  ;;  %v2135_v4 = vadd.f32 %v2130_v32, %v2095_v59 }
 0x8b4   : > { %v2119_v35 = vpop.f32.mrf.mxu2  ;;  %v2132_v23 = vpop.f32.mrf.mxu3 }
 0x8b5   : > { %v2168_v40 = vpop.f32.mrf.mxu0  ;;  %v2181_v53 = vpop.f32.mrf.mxu1 }
 0x8b6   : > { %v2185_v5 = vadd.f32 %v2168_v40, %v2134_v3  ;;  %v2186_v20 = vadd.f32 %v2181_v53, %v2135_v4 }
 0x8bc   : > { %v2219_v54 = vpop.f32.mrf.mxu2  ;;  %v2232_v24 = vpop.f32.mrf.mxu3 }
 0x8bd   : > { %v2170_v44 = vpop.f32.mrf.mxu0  ;;  %v2183_v51 = vpop.f32.mrf.mxu1  ;;  %v2236_v61 = vadd.f32 %v2219_v54, %v2185_v5  ;;  %v2237_v38 = vadd.f32 %v2232_v24, %v2186_v20 }
 0x8c4   : > { %v2221_v60 = vpop.f32.mrf.mxu2  ;;  %v2234_v0 = vpop.f32.mrf.mxu3 }
 0x8c5   : > { %v2270_v42 = vpop.f32.mrf.mxu0  ;;  %v2283_v43 = vpop.f32.mrf.mxu1 }
 0x8c6   : > { %v2287_v39 = vadd.f32 %v2270_v42, %v2236_v61  ;;  %v2288_v62 = vadd.f32 %v2283_v43, %v2237_v38 }
 0x8cc   : > { %v2321_v11 = vpop.f32.mrf.mxu2  ;;  %v2334_v45 = vpop.f32.mrf.mxu3 }
 0x8cd   : > { %v2338_v46 = vadd.f32 %v2321_v11, %v2287_v39  ;;  %v2339_v1 = vadd.f32 %v2334_v45, %v2288_v62  ;;  %v2272_v31 = vpop.f32.mrf.mxu0  ;;  %v2285_v63 = vpop.f32.mrf.mxu1 }
 0x8cf   : > { %v2340_v9 = vadd.f32 %v2772_v34, %v2338_v46  ;;  %v2341_v37 = vadd.f32 %v2773_v41, %v2339_v1 }
 0x8d1   : > { %2538 = vst [vmem:[%s3473_s13 + $0x10] sm:$0xff] %v2340_v9 }
 0x8d2   : > { %2539 = vst [vmem:[%s3473_s13 + $0x18] sm:$0xff] %v2341_v37 }
 0x8d3   : > { %2801 = shalt.err (!%p2798_p3)
}
 0x8d4   : > { %s2847_s21 = smov 256   ;;  %v2323_v15 = vpop.f32.mrf.mxu2  ;;  %v2336_v12 = vpop.f32.mrf.mxu3 }
 0x8d5   : > { %2549 = dma.vmem_to_hbm [thread:$0]  (%p2931_p5), %s2360_s25, 512, %s2362_s9, %s2346_s20, %s2847_s21, %s2847_s21, %s2841_s12  }
 0x8d6 PF: > { %p2555_p4 = scmp.ge.s32.totalorder %s2836_s30, 2  ;;  %s2376_s26 = sand.u32 1, %s2824_s27  }
 0x8d7   : > { %s2377_s13 = scalar_lea.sflag [#allocation3], %s2376_s26 }
 0x8d8   : > { %p2552_p7 = pnand %p2555_p4, %p2935_p6 }
 0x8da   : > { %p2553_p8 = pneg %p2552_p7 }
 0x8dc   : > { %2819 = dma.done.wait (%p2553_p8), %s2377_s13, 512  }
 0x8dd   : > { %2821 = vsyncadd (%p2553_p8), %s2377_s13, 4294966784  ;;  %p18_p5 = scmp.ge.s32.totalorder %s2918_s11, 4   ;;  %s3671_s27 = smov %s2828_s28 }
 0x8de   : > { %s3672_s28 = smov %s2832_s29  ;;  %s3673_s29 = smov %s2929_s14 }
 0x8df   : > { %s3674_s30 = smov %s2918_s11  ;;  %20 = sbr.rel (!%p18_p5) target bundleno = 3 (0x3), region = 105 }
 0x8e4   :  { %2383 = vsyncpa [#allocation3], 1 }
 0x8e5   :  { %2385 = vsyncpa [#allocation3 + $0x1], 1 }

</bundles_post_ra>
